<compile_context>
chip_gen: v7x
topology: tpu7x:2x2x1
jax: 0.10.0
libtpu: 0.0.40
codegen_flags: <defaults>
</compile_context>

<pallas_src>
import functools

import jax
import jax.numpy as jnp
from jax import lax
from jax.experimental import pallas as pl
from jax.experimental.pallas import tpu as pltpu

LANE = 128


def _round_up(x, m):
    return (x + m - 1) // m * m


def bn_fold(gamma, beta, mean, var, eps=1e-5):
    scale = gamma / jnp.sqrt(var + eps)
    return scale, beta - mean * scale


# ----------------------------- Pallas kernel --------------------------------

def _bottleneck_kernel(*refs, nb, P, Hq, Wq8, Ho, stride, has_sc_conv):
    """One grid step = nb images; every intermediate stays in VMEM."""
    if has_sc_conv:
        (x_ref, w1_ref, w2_ref, b2_ref, w3_ref, b3_ref, ws_ref,
         o_ref, y1_ref) = refs
    else:
        (x_ref, w1_ref, w2_ref, b2_ref, w3_ref, b3_ref,
         o_ref, y1_ref) = refs
        ws_ref = None

    NBP = nb * P
    Cip = x_ref.shape[-1]
    Cz = w1_ref.shape[1]
    Co = w3_ref.shape[1]
    s = stride
    M = Ho * Wq8                      # full-width M for conv2/conv3/shortcut

    # ---- conv1 (1x1) + bn1 + relu: ONE fused matmul over all images/phases.
    # b1 and the conv2 pad-ring masking are folded into the input's "ones"
    # channel: valid pixels carry 1 there (so +b1 lands via the matching row
    # of w1), pad/ring pixels carry 0 -> relu(0) == 0 exactly, which is what
    # conv2's implicit zero padding needs.  No iota mask, no bias broadcast.
    x_all = x_ref[...].reshape(NBP * Hq * Wq8, Cip)
    z = jnp.dot(x_all, w1_ref[...], preferred_element_type=jnp.float32)
    y1_ref[...] = jnp.maximum(z, 0.0).astype(y1_ref.dtype).reshape(
        NBP, Hq, Wq8, Cz)

    b2 = b2_ref[...]
    b3 = b3_ref[...]

    # Tap bookkeeping for the strided 3x3 conv: tap (dh, dw) reads phase
    # p = (dh%s)*s + (dw%s) at row offset dh//s and column offset dw//s.
    # Taps are grouped by column offset; the (<=2) non-zero offsets are
    # realised with one f32 sublane roll (XLU) on the group's matmul result
    # instead of 9 misaligned slice+flatten relayouts of bf16 activations.
    groups = {}
    for dh in range(3):
        for dw in range(3):
            p = (dh % s) * s + (dw % s)
            groups.setdefault(dw // s, []).append((p, dh // s, dh * 3 + dw))

    for n in range(nb):               # static unroll; nb stays small
        base = n * P

        # ---- conv2 (3x3, stride, pad=1) + bn2 + relu, f32 accumulation.
        acc = None
        for w_off in sorted(groups):
            part = None
            for (p, h_off, t) in groups[w_off]:
                src = y1_ref[base + p, pl.ds(h_off, Ho), :, :].reshape(M, Cz)
                d = jnp.dot(src, w2_ref[t], preferred_element_type=jnp.float32)
                part = d if part is None else part + d
            if w_off:
                # result[i] = part[i + w_off]; the wrap only lands in columns
                # >= Wo which the wrapper discards.
                part = pltpu.roll(part, shift=M - w_off, axis=0)
            acc = part if acc is None else acc + part
        y2 = jnp.maximum(acc + b2, 0.0).astype(jnp.bfloat16)

        # ---- conv3 (1x1) + bn3
        y3 = jnp.dot(y2, w3_ref[...], preferred_element_type=jnp.float32) + b3

        # ---- shortcut
        p_sc = (1 % s) * s + (1 % s)
        off = 1 // s
        xs = x_ref[base + p_sc, pl.ds(off, Ho), :, :].reshape(M, Cip)
        if has_sc_conv:
            # 1x1 conv + bn; bs is folded into the "ones" row of ws.
            sc = jnp.dot(xs, ws_ref[...], preferred_element_type=jnp.float32)
        else:
            # identity: no matmul, no bf16 re-rounding through the MXU.
            sc = xs[:, :Co].astype(jnp.float32)
        if off:
            sc = pltpu.roll(sc, shift=M - off, axis=0)

        # ---- residual add + relu, lane/sublane-dense bf16 store.
        o_ref[n] = jnp.maximum(y3 + sc, 0.0).astype(o_ref.dtype).reshape(
            Ho, Wq8, Co)


# ------------------------------- JAX glue ------------------------------------

def prepare_weights(p, in_c, zip_c, out_c, cip, has_sc_conv):
    """Fold BN into weights; fold b1/bs into the 'ones'-channel weight row;
    pad channel dims to the 128-lane width."""
    Cz = _round_up(zip_c, LANE)
    Co = _round_up(out_c, LANE)
    s1, b1 = bn_fold(*p["bn1"])
    s2, b2 = bn_fold(*p["bn2"])
    s3, b3 = bn_fold(*p["bn3"])

    w1 = p["w1"].reshape(zip_c, in_c).T * s1[None, :]                 # (in, zip)
    w1a = jnp.zeros((cip, Cz), jnp.float32)
    w1a = w1a.at[:in_c, :zip_c].set(w1).at[in_c, :zip_c].set(b1)      # bias row

    w2 = jnp.transpose(p["w2"], (2, 3, 1, 0)) * s2[None, None, None, :]
    w2 = w2.reshape(9, zip_c, zip_c)                                  # tap-major
    w2p = jnp.zeros((9, Cz, Cz), jnp.float32).at[:, :zip_c, :zip_c].set(w2)

    w3 = p["w3"].reshape(out_c, zip_c).T * s3[None, :]                # (zip, out)
    w3p = jnp.zeros((Cz, Co), jnp.float32).at[:zip_c, :out_c].set(w3)

    wd = dict(w1=w1a.astype(jnp.bfloat16),
              w2=w2p.astype(jnp.bfloat16),
              b2=jnp.zeros((1, Cz), jnp.float32).at[0, :zip_c].set(b2),
              w3=w3p.astype(jnp.bfloat16),
              b3=jnp.zeros((1, Co), jnp.float32).at[0, :out_c].set(b3),
              Cz=Cz, Co=Co)
    if has_sc_conv:
        ss, bs = bn_fold(*p["bns"])
        ws = p["ws"].reshape(out_c, in_c).T * ss[None, :]             # (in, out)
        wsa = jnp.zeros((cip, Co), jnp.float32)
        wsa = wsa.at[:in_c, :out_c].set(ws).at[in_c, :out_c].set(bs)  # bias row
        wd["ws"] = wsa.astype(jnp.bfloat16)
    return wd


def prepare_input(x_nhwc, stride):
    """Append the 'ones' bias channel, lane-pad channels, zero-pad spatially
    (pad=1) and split into stride*stride phases so every in-kernel access is a
    plain aligned slice."""
    n, h, w, c = x_nhwc.shape
    s = stride
    cip = _round_up(c + 1, LANE)
    hp = s * pl.cdiv(h + 2, s)
    wp = s * pl.cdiv(w + 2, s)
    hq, wq = hp // s, wp // s
    wq8 = _round_up(wq, 8)
    ones = jnp.ones((n, h, w, 1), x_nhwc.dtype)
    xa = jnp.concatenate([x_nhwc, ones], axis=-1)
    xa = jnp.pad(xa, ((0, 0), (0, 0), (0, 0), (0, cip - c - 1)))
    xp = jnp.pad(xa, ((0, 0), (1, hp - h - 1), (1, wp - w - 1), (0, 0)))
    xr = xp.reshape(n, hq, s, wq, s, cip)
    xph = jnp.transpose(xr, (0, 2, 4, 1, 3, 5)).reshape(n * s * s, hq, wq, cip)
    if wq8 != wq:
        xph = jnp.pad(xph, ((0, 0), (0, 0), (0, wq8 - wq), (0, 0)))
    return xph, hq, wq8, cip


def _pick_nb(N, P, Hq, Wq8, Ho, Cip, Cz, Co):
    """Images per grid step: amortize per-step overhead / grow matmul M while
    keeping >=2 parallel grid steps (v7x has 2 TCs) and fitting a VMEM budget."""
    per_img = (2 * P * Hq * Wq8 * Cip * 2        # x block (bf16, double-buffered)
               + P * Hq * Wq8 * Cz * 2           # y1 scratch (bf16)
               + P * Hq * Wq8 * Cz * 4           # conv1 f32 result
               + 2 * Ho * Wq8 * Co * 2           # out block (bf16, double-buffered)
               + Ho * Wq8 * (2 * Cz + 2 * Co) * 4)  # conv2/3/shortcut f32 temps
    budget = 24 * 1024 * 1024
    nb = max(1, min(N // 2, budget // max(per_img, 1)))
    while nb > 1 and N % nb:
        nb -= 1
    return nb


@functools.partial(jax.jit, static_argnums=(2,))
def bottleneck_forward(x_nchw, params, stride):
    """Pallas implementation of Bottleneck.forward.  Input/output are NCHW."""
    x = jnp.transpose(x_nchw, (0, 2, 3, 1)).astype(jnp.bfloat16)      # NHWC bf16
    N, H, W, in_c = x.shape
    zip_c = params["w1"].shape[0]
    out_c = params["w3"].shape[0]
    s = stride
    P = s * s
    Ho = (H - 1) // s + 1
    Wo = (W - 1) // s + 1
    has_sc_conv = "ws" in params

    xph, Hq, Wq8, Cip = prepare_input(x, s)
    wd = prepare_weights(params, in_c, zip_c, out_c, Cip, has_sc_conv)
    Cz, Co = wd["Cz"], wd["Co"]

    nb = _pick_nb(N, P, Hq, Wq8, Ho, Cip, Cz, Co)
    kernel = functools.partial(_bottleneck_kernel, nb=nb, P=P, Hq=Hq, Wq8=Wq8,
                               Ho=Ho, stride=s, has_sc_conv=has_sc_conv)

    in_specs = [
        pl.BlockSpec((nb * P, Hq, Wq8, Cip), lambda i: (i, 0, 0, 0)),  # x phases
        pl.BlockSpec((Cip, Cz), lambda i: (0, 0)),                     # w1 (b1 folded)
        pl.BlockSpec((9, Cz, Cz), lambda i: (0, 0, 0)),                # w2 taps
        pl.BlockSpec((1, Cz), lambda i: (0, 0)),                       # b2
        pl.BlockSpec((Cz, Co), lambda i: (0, 0)),                      # w3
        pl.BlockSpec((1, Co), lambda i: (0, 0)),                       # b3
    ]
    operands = [xph, wd["w1"], wd["w2"], wd["b2"], wd["w3"], wd["b3"]]
    if has_sc_conv:
        in_specs.append(pl.BlockSpec((Cip, Co), lambda i: (0, 0)))     # ws (bs folded)
        operands.append(wd["ws"])

    out = pl.pallas_call(
        kernel,
        out_shape=jax.ShapeDtypeStruct((N, Ho, Wq8, Co), jnp.bfloat16),
        grid=(N // nb,),
        in_specs=in_specs,
        out_specs=pl.BlockSpec((nb, Ho, Wq8, Co), lambda i: (i, 0, 0, 0)),
        scratch_shapes=[pltpu.VMEM((nb * P, Hq, Wq8, Cz), jnp.bfloat16)],
        compiler_params=pltpu.CompilerParams(
            dimension_semantics=("parallel",),
            vmem_limit_bytes=48 * 1024 * 1024),
    )(*operands)

    # TODO(synk): when chaining bottlenecks, keep the padded NHWC bf16 layout
    # end-to-end and only de-pad / transpose at network boundaries.
    out = out[:, :, :Wo, :out_c]
    return jnp.transpose(out, (0, 3, 1, 2)).astype(jnp.float32)       # -> NCHW


# --------------------------- parameters / reference --------------------------

def init_params(key, in_c, zip_c, stride):
    out_c = 4 * zip_c
    ks = jax.random.split(key, 8)

    def conv_w(k, o, i, kh, kw):
        fan_in = i * kh * kw
        return (jax.random.normal(k, (o, i, kh, kw), jnp.float32)
                / jnp.sqrt(fan_in))

    def bn_p(k, c):
        k1, k2, k3, k4 = jax.random.split(k, 4)
        gamma = 1.0 + 0.1 * jax.random.normal(k1, (c,), jnp.float32)
        beta = 0.1 * jax.random.normal(k2, (c,), jnp.float32)
        mean = 0.1 * jax.random.normal(k3, (c,), jnp.float32)
        var = jnp.abs(jax.random.normal(k4, (c,), jnp.float32)) + 0.5
        return (gamma, beta, mean, var)

    p = {
        "w1": conv_w(ks[0], zip_c, in_c, 1, 1), "bn1": bn_p(ks[1], zip_c),
        "w2": conv_w(ks[2], zip_c, zip_c, 3, 3), "bn2": bn_p(ks[3], zip_c),
        "w3": conv_w(ks[4], out_c, zip_c, 1, 1), "bn3": bn_p(ks[5], out_c),
    }
    if stride != 1 or in_c != out_c:
        p["ws"] = conv_w(ks[6], out_c, in_c, 1, 1)
        p["bns"] = bn_p(ks[7], out_c)
    return p


def ref_forward(x_nchw, p, stride):
    """Pure-JAX f32 reference (lax.conv) for correctness checking."""
    x = jnp.transpose(x_nchw, (0, 2, 3, 1)).astype(jnp.float32)

    def conv(v, w_oihw, s, pad):
        w = jnp.transpose(w_oihw, (2, 3, 1, 0))  # HWIO
        return lax.conv_general_dilated(
            v, w, (s, s), pad, dimension_numbers=("NHWC", "HWIO", "NHWC"))

    def bn(v, params):
        sc, bi = bn_fold(*params)
        return v * sc + bi

    y = jnp.maximum(bn(conv(x, p["w1"], 1, "VALID"), p["bn1"]), 0.0)
    y = jnp.maximum(bn(conv(y, p["w2"], stride, ((1, 1), (1, 1))), p["bn2"]), 0.0)
    y = bn(conv(y, p["w3"], 1, "VALID"), p["bn3"])
    if "ws" in p:
        sc = bn(conv(x, p["ws"], stride, "VALID"), p["bns"])
    else:
        sc = x
    out = jnp.maximum(y + sc, 0.0)
    return jnp.transpose(out, (0, 3, 1, 2))


# ----------------------------------- main ------------------------------------

if __name__ == "__main__":
    key = jax.random.PRNGKey(0)
    k1, k2, k3, k4 = jax.random.split(key, 4)

    # Case 1: projection shortcut (stride=2, in_c != out_c).
    x1 = jax.random.normal(k1, (2, 16, 16, 16), jnp.float32)          # NCHW
    p1 = init_params(k2, 16, 8, 2)
    out1 = jax.block_until_ready(bottleneck_forward(x1, p1, 2))
    ref1 = jax.block_until_ready(ref_forward(x1, p1, 2))
    assert out1.shape == ref1.shape == (2, 32, 8, 8), out1.shape
    err1 = float(jnp.max(jnp.abs(out1 - ref1)))
    assert jnp.allclose(out1, ref1, rtol=5e-2, atol=1e-1), err1

    # Case 2: identity shortcut (stride=1, in_c == out_c) -> no shortcut matmul.
    x2 = jax.random.normal(k3, (2, 32, 16, 16), jnp.float32)          # NCHW
    p2 = init_params(k4, 32, 8, 1)
    out2 = jax.block_until_ready(bottleneck_forward(x2, p2, 1))
    ref2 = jax.block_until_ready(ref_forward(x2, p2, 1))
    assert out2.shape == ref2.shape == (2, 32, 16, 16), out2.shape
    err2 = float(jnp.max(jnp.abs(out2 - ref2)))
    assert jnp.allclose(out2, ref2, rtol=5e-2, atol=1e-1), err2

    print("KERNEL_OK")
</pallas_src>

<mosaic_0001>
module attributes {stable_mosaic.version = 11 : i64} {
  func.func @_bottleneck_kernel(%arg0: i32, %arg1: memref<4x9x16x128xbf16, #tpu.memory_space<vmem>>, %arg2: memref<128x128xbf16, #tpu.memory_space<vmem>>, %arg3: memref<9x128x128xbf16, #tpu.memory_space<vmem>>, %arg4: memref<1x128xf32, #tpu.memory_space<vmem>>, %arg5: memref<128x128xbf16, #tpu.memory_space<vmem>>, %arg6: memref<1x128xf32, #tpu.memory_space<vmem>>, %arg7: memref<128x128xbf16, #tpu.memory_space<vmem>>, %arg8: memref<1x8x16x128xbf16, #tpu.memory_space<vmem>>, %arg9: memref<4x9x16x128xbf16, #tpu.memory_space<vmem>>) attributes {dimension_semantics = [#tpu.dimension_semantics<parallel>], iteration_bounds = array<i64: 2>, scalar_prefetch = 0 : i64, scratch_operands = 1 : i64, tpu.core_type = #tpu.core_type<tc>, window_params = [{transform_indices = @transform_0, window_bounds = array<i64: 4, 9, 16, 128>}, {pipeline_mode = #tpu.pipeline_mode<synchronous>, transform_indices = @transform_1, window_bounds = array<i64: 128, 128>}, {pipeline_mode = #tpu.pipeline_mode<synchronous>, transform_indices = @transform_2, window_bounds = array<i64: 9, 128, 128>}, {pipeline_mode = #tpu.pipeline_mode<synchronous>, transform_indices = @transform_3, window_bounds = array<i64: 1, 128>}, {pipeline_mode = #tpu.pipeline_mode<synchronous>, transform_indices = @transform_4, window_bounds = array<i64: 128, 128>}, {pipeline_mode = #tpu.pipeline_mode<synchronous>, transform_indices = @transform_5, window_bounds = array<i64: 1, 128>}, {pipeline_mode = #tpu.pipeline_mode<synchronous>, transform_indices = @transform_6, window_bounds = array<i64: 128, 128>}, {transform_indices = @transform_7, window_bounds = array<i64: 1, 8, 16, 128>}]} {
    %c0 = arith.constant 0 : index
    %c0_0 = arith.constant 0 : index
    %c0_1 = arith.constant 0 : index
    %c0_2 = arith.constant 0 : index
    %0 = vector.load %arg1[%c0, %c0_0, %c0_1, %c0_2] : memref<4x9x16x128xbf16, #tpu.memory_space<vmem>>, vector<4x9x16x128xbf16>
    %1 = vector.shape_cast %0 : vector<4x9x16x128xbf16> to vector<576x128xbf16>
    %c0_3 = arith.constant 0 : index
    %c0_4 = arith.constant 0 : index
    %2 = vector.load %arg2[%c0_3, %c0_4] : memref<128x128xbf16, #tpu.memory_space<vmem>>, vector<128x128xbf16>
    %cst = arith.constant dense<0.000000e+00> : vector<576x128xf32>
    %3 = tpu.matmul %1, %2, %cst {dimension_numbers = #tpu.dot_dimension_numbers<[1], [0], [0], [1], [0, 0, 1, 1], [], []>} : vector<576x128xbf16>, vector<128x128xbf16>, vector<576x128xf32> -> vector<576x128xf32>
    %cst_5 = arith.constant 0.000000e+00 : f32
    %4 = vector.broadcast %cst_5 : f32 to vector<576x128xf32>
    %5 = arith.maximumf %3, %4 : vector<576x128xf32>
    %6 = arith.truncf %5 : vector<576x128xf32> to vector<576x128xbf16>
    %7 = vector.shape_cast %6 : vector<576x128xbf16> to vector<4x9x16x128xbf16>
    %c0_6 = arith.constant 0 : index
    %c0_7 = arith.constant 0 : index
    %c0_8 = arith.constant 0 : index
    %c0_9 = arith.constant 0 : index
    %8 = vector.load %arg9[%c0_6, %c0_7, %c0_8, %c0_9] : memref<4x9x16x128xbf16, #tpu.memory_space<vmem>>, vector<4x9x16x128xbf16>
    tpu.vector_store %arg9[%c0_6, %c0_7, %c0_8, %c0_9], %7 {strides = array<i32>} : memref<4x9x16x128xbf16, #tpu.memory_space<vmem>>, vector<4x9x16x128xbf16>,
    %c0_10 = arith.constant 0 : index
    %c0_11 = arith.constant 0 : index
    %9 = vector.load %arg4[%c0_10, %c0_11] : memref<1x128xf32, #tpu.memory_space<vmem>>, vector<1x128xf32>
    %c0_12 = arith.constant 0 : index
    %c0_13 = arith.constant 0 : index
    %10 = vector.load %arg6[%c0_12, %c0_13] : memref<1x128xf32, #tpu.memory_space<vmem>>, vector<1x128xf32>
    %c0_14 = arith.constant 0 : index
    %c0_15 = arith.constant 0 : index
    %c0_16 = arith.constant 0 : index
    %c0_17 = arith.constant 0 : index
    %11 = vector.load %arg9[%c0_14, %c0_15, %c0_16, %c0_17] : memref<4x9x16x128xbf16, #tpu.memory_space<vmem>>, vector<1x8x16x128xbf16>
    %12 = vector.shape_cast %11 : vector<1x8x16x128xbf16> to vector<8x16x128xbf16>
    %13 = vector.shape_cast %12 : vector<8x16x128xbf16> to vector<128x128xbf16>
    %c0_18 = arith.constant 0 : index
    %c0_19 = arith.constant 0 : index
    %c0_20 = arith.constant 0 : index
    %14 = vector.load %arg3[%c0_18, %c0_19, %c0_20] : memref<9x128x128xbf16, #tpu.memory_space<vmem>>, vector<1x128x128xbf16>
    %15 = vector.shape_cast %14 : vector<1x128x128xbf16> to vector<128x128xbf16>
    %cst_21 = arith.constant dense<0.000000e+00> : vector<128x128xf32>
    %16 = tpu.matmul %13, %15, %cst_21 {dimension_numbers = #tpu.dot_dimension_numbers<[1], [0], [0], [1], [0, 0, 1, 1], [], []>} : vector<128x128xbf16>, vector<128x128xbf16>, vector<128x128xf32> -> vector<128x128xf32>
    %c1 = arith.constant 1 : index
    %c0_22 = arith.constant 0 : index
    %c0_23 = arith.constant 0 : index
    %c0_24 = arith.constant 0 : index
    %17 = vector.load %arg9[%c1, %c0_22, %c0_23, %c0_24] : memref<4x9x16x128xbf16, #tpu.memory_space<vmem>>, vector<1x8x16x128xbf16>
    %18 = vector.shape_cast %17 : vector<1x8x16x128xbf16> to vector<8x16x128xbf16>
    %19 = vector.shape_cast %18 : vector<8x16x128xbf16> to vector<128x128xbf16>
    %c1_25 = arith.constant 1 : index
    %c0_26 = arith.constant 0 : index
    %c0_27 = arith.constant 0 : index
    %20 = vector.load %arg3[%c1_25, %c0_26, %c0_27] : memref<9x128x128xbf16, #tpu.memory_space<vmem>>, vector<1x128x128xbf16>
    %21 = vector.shape_cast %20 : vector<1x128x128xbf16> to vector<128x128xbf16>
    %cst_28 = arith.constant dense<0.000000e+00> : vector<128x128xf32>
    %22 = tpu.matmul %19, %21, %cst_28 {dimension_numbers = #tpu.dot_dimension_numbers<[1], [0], [0], [1], [0, 0, 1, 1], [], []>} : vector<128x128xbf16>, vector<128x128xbf16>, vector<128x128xf32> -> vector<128x128xf32>
    %23 = arith.addf %16, %22 : vector<128x128xf32>
    %c2 = arith.constant 2 : index
    %c0_29 = arith.constant 0 : index
    %c0_30 = arith.constant 0 : index
    %c0_31 = arith.constant 0 : index
    %24 = vector.load %arg9[%c2, %c0_29, %c0_30, %c0_31] : memref<4x9x16x128xbf16, #tpu.memory_space<vmem>>, vector<1x8x16x128xbf16>
    %25 = vector.shape_cast %24 : vector<1x8x16x128xbf16> to vector<8x16x128xbf16>
    %26 = vector.shape_cast %25 : vector<8x16x128xbf16> to vector<128x128xbf16>
    %c3 = arith.constant 3 : index
    %c0_32 = arith.constant 0 : index
    %c0_33 = arith.constant 0 : index
    %27 = vector.load %arg3[%c3, %c0_32, %c0_33] : memref<9x128x128xbf16, #tpu.memory_space<vmem>>, vector<1x128x128xbf16>
    %28 = vector.shape_cast %27 : vector<1x128x128xbf16> to vector<128x128xbf16>
    %cst_34 = arith.constant dense<0.000000e+00> : vector<128x128xf32>
    %29 = tpu.matmul %26, %28, %cst_34 {dimension_numbers = #tpu.dot_dimension_numbers<[1], [0], [0], [1], [0, 0, 1, 1], [], []>} : vector<128x128xbf16>, vector<128x128xbf16>, vector<128x128xf32> -> vector<128x128xf32>
    %30 = arith.addf %23, %29 : vector<128x128xf32>
    %c3_35 = arith.constant 3 : index
    %c0_36 = arith.constant 0 : index
    %c0_37 = arith.constant 0 : index
    %c0_38 = arith.constant 0 : index
    %31 = vector.load %arg9[%c3_35, %c0_36, %c0_37, %c0_38] : memref<4x9x16x128xbf16, #tpu.memory_space<vmem>>, vector<1x8x16x128xbf16>
    %32 = vector.shape_cast %31 : vector<1x8x16x128xbf16> to vector<8x16x128xbf16>
    %33 = vector.shape_cast %32 : vector<8x16x128xbf16> to vector<128x128xbf16>
    %c4 = arith.constant 4 : index
    %c0_39 = arith.constant 0 : index
    %c0_40 = arith.constant 0 : index
    %34 = vector.load %arg3[%c4, %c0_39, %c0_40] : memref<9x128x128xbf16, #tpu.memory_space<vmem>>, vector<1x128x128xbf16>
    %35 = vector.shape_cast %34 : vector<1x128x128xbf16> to vector<128x128xbf16>
    %cst_41 = arith.constant dense<0.000000e+00> : vector<128x128xf32>
    %36 = tpu.matmul %33, %35, %cst_41 {dimension_numbers = #tpu.dot_dimension_numbers<[1], [0], [0], [1], [0, 0, 1, 1], [], []>} : vector<128x128xbf16>, vector<128x128xbf16>, vector<128x128xf32> -> vector<128x128xf32>
    %37 = arith.addf %30, %36 : vector<128x128xf32>
    %c0_42 = arith.constant 0 : index
    %c1_43 = arith.constant 1 : index
    %c0_44 = arith.constant 0 : index
    %c0_45 = arith.constant 0 : index
    %38 = vector.load %arg9[%c0_42, %c1_43, %c0_44, %c0_45] : memref<4x9x16x128xbf16, #tpu.memory_space<vmem>>, vector<1x8x16x128xbf16>
    %39 = vector.shape_cast %38 : vector<1x8x16x128xbf16> to vector<8x16x128xbf16>
    %40 = vector.shape_cast %39 : vector<8x16x128xbf16> to vector<128x128xbf16>
    %c6 = arith.constant 6 : index
    %c0_46 = arith.constant 0 : index
    %c0_47 = arith.constant 0 : index
    %41 = vector.load %arg3[%c6, %c0_46, %c0_47] : memref<9x128x128xbf16, #tpu.memory_space<vmem>>, vector<1x128x128xbf16>
    %42 = vector.shape_cast %41 : vector<1x128x128xbf16> to vector<128x128xbf16>
    %cst_48 = arith.constant dense<0.000000e+00> : vector<128x128xf32>
    %43 = tpu.matmul %40, %42, %cst_48 {dimension_numbers = #tpu.dot_dimension_numbers<[1], [0], [0], [1], [0, 0, 1, 1], [], []>} : vector<128x128xbf16>, vector<128x128xbf16>, vector<128x128xf32> -> vector<128x128xf32>
    %44 = arith.addf %37, %43 : vector<128x128xf32>
    %c1_49 = arith.constant 1 : index
    %c1_50 = arith.constant 1 : index
    %c0_51 = arith.constant 0 : index
    %c0_52 = arith.constant 0 : index
    %45 = vector.load %arg9[%c1_49, %c1_50, %c0_51, %c0_52] : memref<4x9x16x128xbf16, #tpu.memory_space<vmem>>, vector<1x8x16x128xbf16>
    %46 = vector.shape_cast %45 : vector<1x8x16x128xbf16> to vector<8x16x128xbf16>
    %47 = vector.shape_cast %46 : vector<8x16x128xbf16> to vector<128x128xbf16>
    %c7 = arith.constant 7 : index
    %c0_53 = arith.constant 0 : index
    %c0_54 = arith.constant 0 : index
    %48 = vector.load %arg3[%c7, %c0_53, %c0_54] : memref<9x128x128xbf16, #tpu.memory_space<vmem>>, vector<1x128x128xbf16>
    %49 = vector.shape_cast %48 : vector<1x128x128xbf16> to vector<128x128xbf16>
    %cst_55 = arith.constant dense<0.000000e+00> : vector<128x128xf32>
    %50 = tpu.matmul %47, %49, %cst_55 {dimension_numbers = #tpu.dot_dimension_numbers<[1], [0], [0], [1], [0, 0, 1, 1], [], []>} : vector<128x128xbf16>, vector<128x128xbf16>, vector<128x128xf32> -> vector<128x128xf32>
    %51 = arith.addf %44, %50 : vector<128x128xf32>
    %c0_56 = arith.constant 0 : index
    %c0_57 = arith.constant 0 : index
    %c0_58 = arith.constant 0 : index
    %c0_59 = arith.constant 0 : index
    %52 = vector.load %arg9[%c0_56, %c0_57, %c0_58, %c0_59] : memref<4x9x16x128xbf16, #tpu.memory_space<vmem>>, vector<1x8x16x128xbf16>
    %53 = vector.shape_cast %52 : vector<1x8x16x128xbf16> to vector<8x16x128xbf16>
    %54 = vector.shape_cast %53 : vector<8x16x128xbf16> to vector<128x128xbf16>
    %c2_60 = arith.constant 2 : index
    %c0_61 = arith.constant 0 : index
    %c0_62 = arith.constant 0 : index
    %55 = vector.load %arg3[%c2_60, %c0_61, %c0_62] : memref<9x128x128xbf16, #tpu.memory_space<vmem>>, vector<1x128x128xbf16>
    %56 = vector.shape_cast %55 : vector<1x128x128xbf16> to vector<128x128xbf16>
    %cst_63 = arith.constant dense<0.000000e+00> : vector<128x128xf32>
    %57 = tpu.matmul %54, %56, %cst_63 {dimension_numbers = #tpu.dot_dimension_numbers<[1], [0], [0], [1], [0, 0, 1, 1], [], []>} : vector<128x128xbf16>, vector<128x128xbf16>, vector<128x128xf32> -> vector<128x128xf32>
    %c2_64 = arith.constant 2 : index
    %c0_65 = arith.constant 0 : index
    %c0_66 = arith.constant 0 : index
    %c0_67 = arith.constant 0 : index
    %58 = vector.load %arg9[%c2_64, %c0_65, %c0_66, %c0_67] : memref<4x9x16x128xbf16, #tpu.memory_space<vmem>>, vector<1x8x16x128xbf16>
    %59 = vector.shape_cast %58 : vector<1x8x16x128xbf16> to vector<8x16x128xbf16>
    %60 = vector.shape_cast %59 : vector<8x16x128xbf16> to vector<128x128xbf16>
    %c5 = arith.constant 5 : index
    %c0_68 = arith.constant 0 : index
    %c0_69 = arith.constant 0 : index
    %61 = vector.load %arg3[%c5, %c0_68, %c0_69] : memref<9x128x128xbf16, #tpu.memory_space<vmem>>, vector<1x128x128xbf16>
    %62 = vector.shape_cast %61 : vector<1x128x128xbf16> to vector<128x128xbf16>
    %cst_70 = arith.constant dense<0.000000e+00> : vector<128x128xf32>
    %63 = tpu.matmul %60, %62, %cst_70 {dimension_numbers = #tpu.dot_dimension_numbers<[1], [0], [0], [1], [0, 0, 1, 1], [], []>} : vector<128x128xbf16>, vector<128x128xbf16>, vector<128x128xf32> -> vector<128x128xf32>
    %64 = arith.addf %57, %63 : vector<128x128xf32>
    %c0_71 = arith.constant 0 : index
    %c1_72 = arith.constant 1 : index
    %c0_73 = arith.constant 0 : index
    %c0_74 = arith.constant 0 : index
    %65 = vector.load %arg9[%c0_71, %c1_72, %c0_73, %c0_74] : memref<4x9x16x128xbf16, #tpu.memory_space<vmem>>, vector<1x8x16x128xbf16>
    %66 = vector.shape_cast %65 : vector<1x8x16x128xbf16> to vector<8x16x128xbf16>
    %67 = vector.shape_cast %66 : vector<8x16x128xbf16> to vector<128x128xbf16>
    %c8 = arith.constant 8 : index
    %c0_75 = arith.constant 0 : index
    %c0_76 = arith.constant 0 : index
    %68 = vector.load %arg3[%c8, %c0_75, %c0_76] : memref<9x128x128xbf16, #tpu.memory_space<vmem>>, vector<1x128x128xbf16>
    %69 = vector.shape_cast %68 : vector<1x128x128xbf16> to vector<128x128xbf16>
    %cst_77 = arith.constant dense<0.000000e+00> : vector<128x128xf32>
    %70 = tpu.matmul %67, %69, %cst_77 {dimension_numbers = #tpu.dot_dimension_numbers<[1], [0], [0], [1], [0, 0, 1, 1], [], []>} : vector<128x128xbf16>, vector<128x128xbf16>, vector<128x128xf32> -> vector<128x128xf32>
    %71 = arith.addf %64, %70 : vector<128x128xf32>
    %c127_i32 = arith.constant 127 : i32
    %72 = tpu.dynamic_rotate %71 by %c127_i32 dim 0 : vector<128x128xf32>, i32 -> vector<128x128xf32>
    %73 = arith.addf %51, %72 : vector<128x128xf32>
    %74 = vector.broadcast %9 : vector<1x128xf32> to vector<128x128xf32>
    %75 = arith.addf %73, %74 : vector<128x128xf32>
    %cst_78 = arith.constant 0.000000e+00 : f32
    %76 = vector.broadcast %cst_78 : f32 to vector<128x128xf32>
    %77 = arith.maximumf %75, %76 : vector<128x128xf32>
    %78 = arith.truncf %77 : vector<128x128xf32> to vector<128x128xbf16>
    %c0_79 = arith.constant 0 : index
    %c0_80 = arith.constant 0 : index
    %79 = vector.load %arg5[%c0_79, %c0_80] : memref<128x128xbf16, #tpu.memory_space<vmem>>, vector<128x128xbf16>
    %cst_81 = arith.constant dense<0.000000e+00> : vector<128x128xf32>
    %80 = tpu.matmul %78, %79, %cst_81 {dimension_numbers = #tpu.dot_dimension_numbers<[1], [0], [0], [1], [0, 0, 1, 1], [], []>} : vector<128x128xbf16>, vector<128x128xbf16>, vector<128x128xf32> -> vector<128x128xf32>
    %81 = vector.broadcast %10 : vector<1x128xf32> to vector<128x128xf32>
    %82 = arith.addf %80, %81 : vector<128x128xf32>
    %c3_82 = arith.constant 3 : index
    %c0_83 = arith.constant 0 : index
    %c0_84 = arith.constant 0 : index
    %c0_85 = arith.constant 0 : index
    %83 = vector.load %arg1[%c3_82, %c0_83, %c0_84, %c0_85] : memref<4x9x16x128xbf16, #tpu.memory_space<vmem>>, vector<1x8x16x128xbf16>
    %84 = vector.shape_cast %83 : vector<1x8x16x128xbf16> to vector<8x16x128xbf16>
    %85 = vector.shape_cast %84 : vector<8x16x128xbf16> to vector<128x128xbf16>
    %c0_86 = arith.constant 0 : index
    %c0_87 = arith.constant 0 : index
    %86 = vector.load %arg7[%c0_86, %c0_87] : memref<128x128xbf16, #tpu.memory_space<vmem>>, vector<128x128xbf16>
    %cst_88 = arith.constant dense<0.000000e+00> : vector<128x128xf32>
    %87 = tpu.matmul %85, %86, %cst_88 {dimension_numbers = #tpu.dot_dimension_numbers<[1], [0], [0], [1], [0, 0, 1, 1], [], []>} : vector<128x128xbf16>, vector<128x128xbf16>, vector<128x128xf32> -> vector<128x128xf32>
    %88 = arith.addf %82, %87 : vector<128x128xf32>
    %cst_89 = arith.constant 0.000000e+00 : f32
    %89 = vector.broadcast %cst_89 : f32 to vector<128x128xf32>
    %90 = arith.maximumf %88, %89 : vector<128x128xf32>
    %91 = arith.truncf %90 : vector<128x128xf32> to vector<128x128xbf16>
    %92 = vector.shape_cast %91 : vector<128x128xbf16> to vector<8x16x128xbf16>
    %c0_90 = arith.constant 0 : index
    %c0_91 = arith.constant 0 : index
    %c0_92 = arith.constant 0 : index
    %c0_93 = arith.constant 0 : index
    %93 = vector.load %arg8[%c0_90, %c0_91, %c0_92, %c0_93] : memref<1x8x16x128xbf16, #tpu.memory_space<vmem>>, vector<1x8x16x128xbf16>
    %94 = vector.shape_cast %93 : vector<1x8x16x128xbf16> to vector<8x16x128xbf16>
    %95 = vector.shape_cast %92 : vector<8x16x128xbf16> to vector<1x8x16x128xbf16>
    tpu.vector_store %arg8[%c0_90, %c0_91, %c0_92, %c0_93], %95 {strides = array<i32>} : memref<1x8x16x128xbf16, #tpu.memory_space<vmem>>, vector<1x8x16x128xbf16>,
    return
  }
  func.func @transform_0(%arg0: i32) -> (i32, i32, i32, i32) {
    %c0_i32 = arith.constant 0 : i32
    %c0_i32_0 = arith.constant 0 : i32
    %c0_i32_1 = arith.constant 0 : i32
    %c0_i32_2 = arith.constant 0 : i32
    return %arg0, %c0_i32, %c0_i32_0, %c0_i32_1 : i32, i32, i32, i32
  }
  func.func @transform_1(%arg0: i32) -> (i32, i32) {
    %c0_i32 = arith.constant 0 : i32
    %c0_i32_0 = arith.constant 0 : i32
    %c0_i32_1 = arith.constant 0 : i32
    return %c0_i32, %c0_i32_0 : i32, i32
  }
  func.func @transform_2(%arg0: i32) -> (i32, i32, i32) {
    %c0_i32 = arith.constant 0 : i32
    %c0_i32_0 = arith.constant 0 : i32
    %c0_i32_1 = arith.constant 0 : i32
    %c0_i32_2 = arith.constant 0 : i32
    return %c0_i32, %c0_i32_0, %c0_i32_1 : i32, i32, i32
  }
  func.func @transform_3(%arg0: i32) -> (i32, i32) {
    %c0_i32 = arith.constant 0 : i32
    %c0_i32_0 = arith.constant 0 : i32
    %c0_i32_1 = arith.constant 0 : i32
    return %c0_i32, %c0_i32_0 : i32, i32
  }
  func.func @transform_4(%arg0: i32) -> (i32, i32) {
    %c0_i32 = arith.constant 0 : i32
    %c0_i32_0 = arith.constant 0 : i32
    %c0_i32_1 = arith.constant 0 : i32
    return %c0_i32, %c0_i32_0 : i32, i32
  }
  func.func @transform_5(%arg0: i32) -> (i32, i32) {
    %c0_i32 = arith.constant 0 : i32
    %c0_i32_0 = arith.constant 0 : i32
    %c0_i32_1 = arith.constant 0 : i32
    return %c0_i32, %c0_i32_0 : i32, i32
  }
  func.func @transform_6(%arg0: i32) -> (i32, i32) {
    %c0_i32 = arith.constant 0 : i32
    %c0_i32_0 = arith.constant 0 : i32
    %c0_i32_1 = arith.constant 0 : i32
    return %c0_i32, %c0_i32_0 : i32, i32
  }
  func.func @transform_7(%arg0: i32) -> (i32, i32, i32, i32) {
    %c0_i32 = arith.constant 0 : i32
    %c0_i32_0 = arith.constant 0 : i32
    %c0_i32_1 = arith.constant 0 : i32
    %c0_i32_2 = arith.constant 0 : i32
    return %arg0, %c0_i32, %c0_i32_0, %c0_i32_1 : i32, i32, i32, i32
  }
}

</mosaic_0001>

<bundles_post_ra>
// kernel: bottleneck_forward.1
= control target key start
LH: loop header
LB: loop body
LE: loop exit
PB: predicated region body
PF: predicated region fallthrough
CT: control target
= control target key end

     0   :  { %s4745_s24 = smov 0   ;;  %s5365_s0 = inlined_call_operand.vmem [shape: bf16[8,9,16,128], index: 0, kind: input, shape index: {}]   ;;  %s5366_s1 = inlined_call_operand.vmem [shape: bf16[128,128], index: 1, kind: input, shape index: {}]   ;;  %s5367_s2 = inlined_call_operand.vmem [shape: bf16[9,128,128], index: 2, kind: input, shape index: {}]   ;;  %s5368_s3 = inlined_call_operand.vmem [shape: f32[1,128], index: 3, kind: input, shape index: {}]   ;;  %s5369_s4 = inlined_call_operand.vmem [shape: bf16[128,128], index: 4, kind: input, shape index: {}]   ;;  %s5370_s5 = inlined_call_operand.vmem [shape: f32[1,128], index: 5, kind: input, shape index: {}]   ;;  %s5371_s6 = inlined_call_operand.vmem [shape: bf16[128,128], index: 6, kind: input, shape index: {}]   ;;  %s5372_s7 = inlined_call_operand.vmem [shape: bf16[2,8,16,128], index: 7, kind: output, shape index: {}]  }
   0x1 LB: > { %s4751_s25 = sadd.s32 4294967295, %s4703_s24   ;;  %p3355_p0 = scmp.ge.s32.totalorder %s4703_s24, 1  ;;  %s4703_s24 = sphi %s4745_s24, %s17_s24  }
   0x2   : > { %p239_p1 = scmp.lt.s32.totalorder %s4703_s24, 3 }
   0x4   : > { %p240_p2 = pnand %p3355_p0, %p239_p1 }
   0x5   : > { %v4557_v0 = vld [vmem:[%s5366_s1] sm:$0xff] (!%p240_p2)   ;;  %s3356_s28 = sshll.u32 (!%p240_p2), %s4751_s25, 2  ;;  %v4558_v1 = vld [vmem:[%s5366_s1 + $0x8] sm:$0xff] (!%p240_p2)   ;;  %v4559_v2 = vld [vmem:[%s5366_s1 + $0x10] sm:$0xff] (!%p240_p2)   ;;  %p279_p4 = scmp.lt.s32.totalorder (!%p240_p2), %s4751_s25, 1 }
   0x6   : > { %243 = sbr.rel (%p240_p2) target bundleno = 951 (0x3b7), region = 48  ;;  %p273_p3 = scmp.lt.s32.totalorder (!%p240_p2), %s3356_s28, 7  ;;  %3948 = vmatprep.subr.bf16.mxu0 (!%p240_p2), %v4557_v0  ;;  %v4560_v3 = vld [vmem:[%s5366_s1 + $0x18] sm:$0xff] (!%p240_p2)   ;;  %v4561_v5 = vld [vmem:[%s5366_s1 + $0x20] sm:$0xff] (!%p240_p2)   ;;  %v4562_v6 = vld [vmem:[%s5366_s1 + $0x28] sm:$0xff] (!%p240_p2)  }
   0x7   : > { %3949 = vmatpush3.bf16.msra.mxu0 (!%p240_p2), %v4557_v0  ;;  %v4563_v7 = vld [vmem:[%s5366_s1 + $0x30] sm:$0xff] (!%p240_p2)   ;;  %v4564_v8 = vld [vmem:[%s5366_s1 + $0x38] sm:$0xff] (!%p240_p2)   ;;  %v4601_v14 = vld [vmem:[%s5367_s2 + $0x140] sm:$0xff] (!%p240_p2)  }
   0x8   : > { %3950 = vmatprep.subr.bf16.mxu0 (!%p240_p2), %v4558_v1  ;;  %v4602_v36 = vld [vmem:[%s5367_s2 + $0x148] sm:$0xff] (!%p240_p2)   ;;  %v4603_v37 = vld [vmem:[%s5367_s2 + $0x40] sm:$0xff] (!%p240_p2)   ;;  %v4605_v41 = vld [vmem:[%s5367_s2 + $0x50] sm:$0xff] (!%p240_p2)  }
   0x9   : > { %4036 = vmatprep.subr.bf16.mxu1 (!%p240_p2), %v4603_v37  ;;  %v4604_v40 = vld [vmem:[%s5367_s2 + $0x48] sm:$0xff] (!%p240_p2)   ;;  %v4606_v44 = vld [vmem:[%s5367_s2 + $0x58] sm:$0xff] (!%p240_p2)   ;;  %v4607_v45 = vld [vmem:[%s5367_s2 + $0x150] sm:$0xff] (!%p240_p2)  }
   0xa   : > { %4037 = vmatpush3.bf16.msra.mxu1 (!%p240_p2), %v4603_v37  ;;  %v4608_v46 = vld [vmem:[%s5367_s2 + $0x60] sm:$0xff] (!%p240_p2)   ;;  %v4609_v49 = vld [vmem:[%s5367_s2 + $0x68] sm:$0xff] (!%p240_p2)   ;;  %v4610_v50 = vld [vmem:[%s5367_s2 + $0x70] sm:$0xff] (!%p240_p2)  }
   0xb   : > { %3951 = vmatpush3.bf16.msra.mxu0 (!%p240_p2), %v4558_v1  ;;  %4038 = vmatprep.subr.bf16.mxu1 (!%p240_p2), %v4604_v40  ;;  %v4611_v53 = vld [vmem:[%s5367_s2 + $0x78] sm:$0xff] (!%p240_p2)   ;;  %v4859_v55 = vld [vmem:[%s5367_s2] sm:$0xff] (!%p240_p2)   ;;  %v4620_v58 = vld [vmem:[%s5367_s2 + $0x168] sm:$0xff] (!%p240_p2)  }
   0xc   : > { %3952 = vmatprep.subr.bf16.mxu0 (!%p240_p2), %v4559_v2  ;;  %v4612_v54 = vld [vmem:[%s5367_s2 + $0x158] sm:$0xff] (!%p240_p2)   ;;  %v4618_v57 = vld [vmem:[%s5367_s2 + $0x160] sm:$0xff] (!%p240_p2)   ;;  %v4622_v59 = vld [vmem:[%s5367_s2 + $0x170] sm:$0xff] (!%p240_p2)  }
   0xd   : > { %s5374_s28 = smov (!%p273_p3, %s3356_s28), 7  ;;  %v4624_v60 = vld [vmem:[%s5367_s2 + $0x178] sm:$0xff]   ;;  %v4878_v61 = vld [vmem:[%s5367_s2 + $0x80] sm:$0xff]   ;;  %s5376_s25 = smov (!%p279_p4, %s4751_s25), 1 }
   0xe   : > { %s4548_s10 = smul.u32 72, %s5374_s28  ;;  %4039 = vmatpush3.bf16.msra.mxu1 %v4604_v40 }
   0xf   : > { %3953 = vmatpush3.bf16.msra.mxu0 %v4559_v2  ;;  %4040 = vmatprep.subr.bf16.mxu1 %v4605_v41 }
  0x10   : > { %s4771_s15 = scalar_lea.vmem %s5365_s0, %s4548_s10  ;;  %3954 = vmatprep.subr.bf16.mxu0 %v4560_v3 }
  0x11   : > { %v4565_v4 = vld [vmem:[%s4771_s15] sm:$0xff]   ;;  %v4566_v9 = vld [vmem:[%s4771_s15 + $0x8] sm:$0xff]   ;;  %v4567_v10 = vld [vmem:[%s4771_s15 + $0x10] sm:$0xff]  }
  0x12   : > { %3964 = vmatprep.mubr.bf16.mxu0 %v4565_v4  ;;  %v4568_v11 = vld [vmem:[%s4771_s15 + $0x18] sm:$0xff]   ;;  %v4569_v12 = vld [vmem:[%s4771_s15 + $0x20] sm:$0xff]   ;;  %v4570_v13 = vld [vmem:[%s4771_s15 + $0x28] sm:$0xff]   ;;  %4041 = vmatpush3.bf16.msra.mxu1 %v4605_v41 }
  0x13   : > { %3955 = vmatpush3.bf16.msra.mxu0 %v4560_v3  ;;  %v4571_v15 = vld [vmem:[%s4771_s15 + $0x30] sm:$0xff]   ;;  %v4572_v16 = vld [vmem:[%s4771_s15 + $0x38] sm:$0xff]   ;;  %v4573_v17 = vld [vmem:[%s4771_s15 + $0x40] sm:$0xff]   ;;  %4042 = vmatprep.subr.bf16.mxu1 %v4606_v44 }
  0x14   : > { %3956 = vmatprep.subr.bf16.mxu0 %v4561_v5  ;;  %v4574_v18 = vld [vmem:[%s4771_s15 + $0x48] sm:$0xff]   ;;  %v4575_v19 = vld [vmem:[%s4771_s15 + $0x50] sm:$0xff]   ;;  %v4576_v20 = vld [vmem:[%s4771_s15 + $0x58] sm:$0xff]  }
  0x15   : > { %v4577_v21 = vld [vmem:[%s4771_s15 + $0x60] sm:$0xff]   ;;  %v4578_v22 = vld [vmem:[%s4771_s15 + $0x68] sm:$0xff]   ;;  %v4579_v23 = vld [vmem:[%s4771_s15 + $0x70] sm:$0xff]  }
  0x16   : > { %v4580_v24 = vld [vmem:[%s4771_s15 + $0x78] sm:$0xff]   ;;  %v4581_v25 = vld [vmem:[%s4771_s15 + $0x80] sm:$0xff]   ;;  %v4582_v26 = vld [vmem:[%s4771_s15 + $0x88] sm:$0xff]   ;;  %4043 = vmatpush3.bf16.msra.mxu1 %v4606_v44 }
  0x17   : > { %3957 = vmatpush3.bf16.msra.mxu0 %v4561_v5  ;;  %v4583_v27 = vld [vmem:[%s4771_s15 + $0x90] sm:$0xff]   ;;  %v4584_v28 = vld [vmem:[%s4771_s15 + $0x98] sm:$0xff]   ;;  %v4585_v29 = vld [vmem:[%s4771_s15 + $0xa0] sm:$0xff]   ;;  %4044 = vmatprep.subr.bf16.mxu1 %v4608_v46 }
  0x18   : > { %3958 = vmatprep.subr.bf16.mxu0 %v4562_v6  ;;  %v4586_v30 = vld [vmem:[%s4771_s15 + $0xa8] sm:$0xff]   ;;  %v4587_v31 = vld [vmem:[%s4771_s15 + $0xb0] sm:$0xff]   ;;  %v4588_v32 = vld [vmem:[%s4771_s15 + $0xb8] sm:$0xff]  }
  0x19   : > { %v4589_v33 = vld [vmem:[%s4771_s15 + $0xc0] sm:$0xff]   ;;  %v4590_v34 = vld [vmem:[%s4771_s15 + $0xc8] sm:$0xff]   ;;  %v4591_v35 = vld [vmem:[%s4771_s15 + $0xd0] sm:$0xff]  }
  0x1a   : > { %v4592_v38 = vld [vmem:[%s4771_s15 + $0xd8] sm:$0xff]   ;;  %v4593_v39 = vld [vmem:[%s4771_s15 + $0xe0] sm:$0xff]   ;;  %v4594_v42 = vld [vmem:[%s4771_s15 + $0xe8] sm:$0xff]   ;;  %4045 = vmatpush3.bf16.msra.mxu1 %v4608_v46 }
  0x1b   : > { %3959 = vmatpush3.bf16.msra.mxu0 %v4562_v6  ;;  %v4595_v43 = vld [vmem:[%s4771_s15 + $0xf0] sm:$0xff]   ;;  %v4596_v47 = vld [vmem:[%s4771_s15 + $0xf8] sm:$0xff]   ;;  %v4597_v48 = vld [vmem:[%s4771_s15 + $0x100] sm:$0xff]   ;;  %4046 = vmatprep.subr.bf16.mxu1 %v4609_v49 }
  0x1c   : > { %3960 = vmatprep.subr.bf16.mxu0 %v4563_v7  ;;  %v4598_v51 = vld [vmem:[%s4771_s15 + $0x108] sm:$0xff]   ;;  %v4599_v52 = vld [vmem:[%s4771_s15 + $0x110] sm:$0xff]   ;;  %v4600_v56 = vld [vmem:[%s4771_s15 + $0x118] sm:$0xff]  }
  0x1e   : > { %4047 = vmatpush3.bf16.msra.mxu1 %v4609_v49 }
  0x1f   : > { %3961 = vmatpush3.bf16.msra.mxu0 %v4563_v7  ;;  %4048 = vmatprep.subr.bf16.mxu1 %v4610_v50 }
  0x20   : > { %3962 = vmatprep.subr.bf16.mxu0 %v4564_v8 }
  0x22   : > { %4049 = vmatpush3.bf16.msra.mxu1 %v4610_v50 }
  0x23   : > { %3963 = vmatpush3.bf16.msra.mxu0 %v4564_v8  ;;  %4050 = vmatprep.subr.bf16.mxu1 %v4611_v53 }
  0x24   : > { %4228 = vmatprep.subr.bf16.mxu0 %v4601_v14 }
  0x26   : > { %3965 = vmatmul.mubr.bf16.vlgmr.msra.gmra.mrb[0].mxu0 %v4566_v9  ;;  %4051 = vmatpush3.bf16.msra.mxu1 %v4611_v53 }
  0x27   : > { %3968 = vmatprep.mubr.bf16.mxu0 %v4567_v10  ;;  %4229 = vmatpush3.bf16.msra.mxu0 %v4601_v14 }
  0x28   : > { %4230 = vmatprep.subr.bf16.mxu0 %v4602_v36  ;;  %4068 = vmatprep.subr.bf16.mxu1 %v4859_v55 }
  0x2b   : > { %4231 = vmatpush3.bf16.msra.mxu0 %v4602_v36 }
  0x2c   : > { %4232 = vmatprep.subr.bf16.mxu0 %v4607_v45 }
  0x2e   : > { %3969 = vmatmul.mubr.bf16.gmra.mrb[4].mxu0 %v4568_v11 }
  0x2f   : > { %3972 = vmatprep.mubr.bf16.mxu0 %v4569_v12  ;;  %4233 = vmatpush3.bf16.msra.mxu0 %v4607_v45 }
  0x30   : > { %4234 = vmatprep.subr.bf16.mxu0 %v4612_v54 }
  0x33   : > { %4235 = vmatpush3.bf16.msra.mxu0 %v4612_v54 }
  0x34   : > { %4236 = vmatprep.subr.bf16.mxu0 %v4618_v57 }
  0x36   : > { %3973 = vmatmul.mubr.bf16.gmra.mrb[8].mxu0 %v4570_v13 }
  0x37   : > { %3976 = vmatprep.mubr.bf16.mxu0 %v4571_v15  ;;  %4237 = vmatpush3.bf16.msra.mxu0 %v4618_v57 }
  0x38   : > { %4238 = vmatprep.subr.bf16.mxu0 %v4620_v58 }
  0x3b   : > { %4239 = vmatpush3.bf16.msra.mxu0 %v4620_v58 }
  0x3c   : > { %4240 = vmatprep.subr.bf16.mxu0 %v4622_v59 }
  0x3e   : > { %3977 = vmatmul.mubr.bf16.gmra.mrb[12].mxu0 %v4572_v16 }
  0x3f   : > { %3980 = vmatprep.mubr.bf16.mxu0 %v4573_v17  ;;  %4241 = vmatpush3.bf16.msra.mxu0 %v4622_v59  ;;  %v4614_v59 = vld [vmem:[%s5367_s2 + $0x8] sm:$0xff]  }
  0x40   : > { %4242 = vmatprep.subr.bf16.mxu0 %v4624_v60 }
  0x43   : > { %4243 = vmatpush3.bf16.msra.mxu0 %v4624_v60 }
  0x44   : > { %4260 = vmatprep.subr.bf16.mxu0 %v4878_v61 }
  0x46   : > { %3981 = vmatmul.mubr.bf16.gmra.mrb[16].mxu0 %v4574_v18 }
  0x47   : > { %3984 = vmatprep.mubr.bf16.mxu0 %v4575_v19 }
  0x4e   : > { %3985 = vmatmul.mubr.bf16.gmra.mrb[20].mxu0 %v4576_v20 }
  0x4f   : > { %3988 = vmatprep.mubr.bf16.mxu0 %v4577_v21 }
  0x56   : > { %3989 = vmatmul.mubr.bf16.gmra.mrb[24].mxu0 %v4578_v22 }
  0x57   : > { %3992 = vmatprep.mubr.bf16.mxu0 %v4579_v23 }
  0x5e   : > { %3993 = vmatmul.mubr.bf16.gmra.mrb[28].mxu0 %v4580_v24 }
  0x5f   : > { %3996 = vmatprep.mubr.bf16.mxu0 %v4581_v25 }
  0x66   : > { %3997 = vmatmul.mubr.bf16.gmra.mrb[32].mxu0 %v4582_v26 }
  0x67   : > { %4000 = vmatprep.mubr.bf16.mxu0 %v4583_v27 }
  0x6e   : > { %4001 = vmatmul.mubr.bf16.gmra.mrb[36].mxu0 %v4584_v28 }
  0x6f   : > { %4004 = vmatprep.mubr.bf16.mxu0 %v4585_v29 }
  0x76   : > { %4005 = vmatmul.mubr.bf16.gmra.mrb[40].mxu0 %v4586_v30 }
  0x77   : > { %4008 = vmatprep.mubr.bf16.mxu0 %v4587_v31 }
  0x7e   : > { %4009 = vmatmul.mubr.bf16.gmra.mrb[44].mxu0 %v4588_v32 }
  0x7f   : > { %4012 = vmatprep.mubr.bf16.mxu0 %v4589_v33 }
  0x86   : > { %4013 = vmatmul.mubr.bf16.gmra.mrb[48].mxu0 %v4590_v34 }
  0x87   : > { %4016 = vmatprep.mubr.bf16.mxu0 %v4591_v35 }
  0x8e   : > { %4017 = vmatmul.mubr.bf16.gmra.mrb[52].mxu0 %v4592_v38 }
  0x8f   : > { %4020 = vmatprep.mubr.bf16.mxu0 %v4593_v39 }
  0x96   : > { %4021 = vmatmul.mubr.bf16.gmra.mrb[56].mxu0 %v4594_v42 }
  0x97   : > { %4024 = vmatprep.mubr.bf16.mxu0 %v4595_v43 }
  0x9e   : > { %4025 = vmatmul.mubr.bf16.gmra.mrb[60].mxu0 %v4596_v47 }
  0x9f   : > { %4028 = vmatprep.mubr.bf16.mxu0 %v4597_v48 }
  0xa6   : > { %4029 = vmatmul.mubr.bf16.gmra.mrb[64].mxu0 %v4598_v51 }
  0xa7   : > { %4032 = vmatprep.mubr.bf16.mxu0 %v4599_v52 }
  0xae   : > { %4033 = vmatmul.mubr.bf16.gmra.mrb[68].mxu0 %v4600_v56 }
  0xf9   : > { %v3966_v62 = vpop.f32.mrb[0].mxu0 }
  0xfa   : > { %v671_v63 = vpop.f32.mrb[1].mxu0  ;;  %v960_v1 = vmax.f32 %v3966_v62, 0.0 }
  0xfb   : > { %v3967_v0 = vpop.f32.mrb[2].mxu0  ;;  %v958_v4 = vmax.f32 %v671_v63, 0.0 }
  0xfc   : > { %v961_v2 = vmax.f32 %v3967_v0, 0.0  ;;  %v674_v3 = vpop.f32.mrb[3].mxu0  ;;  %v4615_v0 = vld [vmem:[%s5367_s2 + $0x10] sm:$0xff]  }
  0xfd   : > { %v959_v5 = vmax.f32 %v674_v3, 0.0 }
  0xfe   : > { %v4881_v6 = vpack.c.bf16 %v961_v2, %v960_v1 }
  0xff   : > { %v4883_v7 = vpack.c.bf16 %v959_v5, %v958_v4 }
 0x101   : > { %v3970_v8 = vpop.f32.mrb[4].mxu0 }
 0x102   : > { %v687_v9 = vpop.f32.mrb[5].mxu0  ;;  %v964_v11 = vmax.f32 %v3970_v8, 0.0 }
 0x103   : > { %v3971_v10 = vpop.f32.mrb[6].mxu0  ;;  %v962_v14 = vmax.f32 %v687_v9, 0.0 }
 0x104   : > { %v965_v12 = vmax.f32 %v3971_v10, 0.0  ;;  %v690_v13 = vpop.f32.mrb[7].mxu0 }
 0x105   : > { %v963_v15 = vmax.f32 %v690_v13, 0.0  ;;  %v4617_v13 = vld [vmem:[%s5367_s2 + $0x20] sm:$0xff]  }
 0x106   : > { %v4885_v16 = vpack.c.bf16 %v965_v12, %v964_v11 }
 0x107   : > { %v4887_v17 = vpack.c.bf16 %v963_v15, %v962_v14 }
 0x109   : > { %v3974_v18 = vpop.f32.mrb[8].mxu0 }
 0x10a   : > { %v703_v19 = vpop.f32.mrb[9].mxu0  ;;  %v968_v21 = vmax.f32 %v3974_v18, 0.0 }
 0x10b   : > { %v3975_v20 = vpop.f32.mrb[10].mxu0  ;;  %v966_v24 = vmax.f32 %v703_v19, 0.0 }
 0x10c   : > { %v969_v22 = vmax.f32 %v3975_v20, 0.0  ;;  %v706_v23 = vpop.f32.mrb[11].mxu0 }
 0x10d   : > { %v967_v25 = vmax.f32 %v706_v23, 0.0  ;;  %v4619_v23 = vld [vmem:[%s5367_s2 + $0x28] sm:$0xff]  }
 0x10e   : > { %v4889_v26 = vpack.c.bf16 %v969_v22, %v968_v21 }
 0x10f   : > { %v4891_v27 = vpack.c.bf16 %v967_v25, %v966_v24 }
 0x111   : > { %v3978_v28 = vpop.f32.mrb[12].mxu0 }
 0x112   : > { %v719_v29 = vpop.f32.mrb[13].mxu0  ;;  %v972_v31 = vmax.f32 %v3978_v28, 0.0 }
 0x113   : > { %v3979_v30 = vpop.f32.mrb[14].mxu0  ;;  %v970_v34 = vmax.f32 %v719_v29, 0.0  ;;  %v4621_v29 = vld [vmem:[%s5367_s2 + $0x30] sm:$0xff]  }
 0x114   : > { %v973_v32 = vmax.f32 %v3979_v30, 0.0  ;;  %v722_v33 = vpop.f32.mrb[15].mxu0 }
 0x115   : > { %v971_v35 = vmax.f32 %v722_v33, 0.0 }
 0x116   : > { %v4893_v36 = vpack.c.bf16 %v973_v32, %v972_v31 }
 0x117   : > { %v4895_v37 = vpack.c.bf16 %v971_v35, %v970_v34 }
 0x119   : > { %v3982_v38 = vpop.f32.mrb[16].mxu0 }
 0x11a   : > { %v735_v39 = vpop.f32.mrb[17].mxu0  ;;  %v976_v41 = vmax.f32 %v3982_v38, 0.0 }
 0x11b   : > { %v3983_v40 = vpop.f32.mrb[18].mxu0  ;;  %v974_v44 = vmax.f32 %v735_v39, 0.0  ;;  %v4623_v39 = vld [vmem:[%s5367_s2 + $0x38] sm:$0xff]  }
 0x11c   : > { %v977_v42 = vmax.f32 %v3983_v40, 0.0  ;;  %v738_v43 = vpop.f32.mrb[19].mxu0 }
 0x11d   : > { %v975_v45 = vmax.f32 %v738_v43, 0.0 }
 0x11e   : > { %v1039_v46 = vpack.c.bf16 %v977_v42, %v976_v41 }
 0x11f   : > { %v4897_v47 = vpack.c.bf16 %v975_v45, %v974_v44  ;;  %v4625_v45 = vld [vmem:[%s5367_s2 + $0xc0] sm:$0xff]  }
 0x120   : > { %4052 = vmatprep.mubr.bf16.mxu1 %v1039_v46 }
 0x121   : > { %v3986_v48 = vpop.f32.mrb[20].mxu0 }
 0x122   : > { %v751_v49 = vpop.f32.mrb[21].mxu0  ;;  %v980_v51 = vmax.f32 %v3986_v48, 0.0 }
 0x123   : > { %v3987_v50 = vpop.f32.mrb[22].mxu0  ;;  %v978_v54 = vmax.f32 %v751_v49, 0.0 }
 0x124   : > { %v981_v52 = vmax.f32 %v3987_v50, 0.0  ;;  %v754_v53 = vpop.f32.mrb[23].mxu0 }
 0x125   : > { %v979_v56 = vmax.f32 %v754_v53, 0.0 }
 0x126   : > { %v4899_v57 = vpack.c.bf16 %v981_v52, %v980_v51  ;;  %v4627_v52 = vld [vmem:[%s5367_s2 + $0xc8] sm:$0xff]  }
 0x127   : > { %v4901_v58 = vpack.c.bf16 %v979_v56, %v978_v54  ;;  %v4628_v54 = vld [vmem:[%s5367_s2 + $0x88] sm:$0xff]  }
 0x129   : > { %v3990_v60 = vpop.f32.mrb[24].mxu0  ;;  %4053 = vmatmul.mubr.bf16.vlgmr.msra.gmra.mrb[0].mxu1 %v4901_v58 }
 0x12a   : > { %4069 = vmatpush3.bf16.msra.mxu1 %v4859_v55  ;;  %v767_v62 = vpop.f32.mrb[25].mxu0  ;;  %4056 = vmatprep.mubr.bf16.mxu1 %v4899_v57  ;;  %v984_v1 = vmax.f32 %v3990_v60, 0.0  ;;  %v4616_v55 = vld [vmem:[%s5367_s2 + $0x18] sm:$0xff]  }
 0x12b   : > { %v3991_v63 = vpop.f32.mrb[26].mxu0  ;;  %4070 = vmatprep.subr.bf16.mxu1 %v4614_v59  ;;  %v982_v4 = vmax.f32 %v767_v62, 0.0 }
 0x12c   : > { %v985_v2 = vmax.f32 %v3991_v63, 0.0  ;;  %v770_v3 = vpop.f32.mrb[27].mxu0  ;;  %v4629_v63 = vld [vmem:[%s5367_s2 + $0xd0] sm:$0xff]  }
 0x12d   : > { %v983_v5 = vmax.f32 %v770_v3, 0.0 }
 0x12e   : > { %v4912_v8 = vpack.c.bf16 %v985_v2, %v984_v1  ;;  %4071 = vmatpush3.bf16.msra.mxu1 %v4614_v59 }
 0x12f   : > { %v4914_v9 = vpack.c.bf16 %v983_v5, %v982_v4  ;;  %4072 = vmatprep.subr.bf16.mxu1 %v4615_v0  ;;  %v4630_v5 = vld [vmem:[%s5367_s2 + $0x90] sm:$0xff]  }
 0x131   : > { %v3994_v10 = vpop.f32.mrb[28].mxu0  ;;  %4057 = vmatmul.mubr.bf16.gmra.mrb[4].mxu1 %v4914_v9 }
 0x132   : > { %4073 = vmatpush3.bf16.msra.mxu1 %v4615_v0  ;;  %v783_v11 = vpop.f32.mrb[29].mxu0  ;;  %4060 = vmatprep.mubr.bf16.mxu1 %v4912_v8  ;;  %v988_v14 = vmax.f32 %v3994_v10, 0.0 }
 0x133   : > { %v3995_v12 = vpop.f32.mrb[30].mxu0  ;;  %4074 = vmatprep.subr.bf16.mxu1 %v4616_v55  ;;  %v986_v19 = vmax.f32 %v783_v11, 0.0 }
 0x134   : > { %v989_v15 = vmax.f32 %v3995_v12, 0.0  ;;  %v786_v18 = vpop.f32.mrb[31].mxu0 }
 0x135   : > { %v987_v20 = vmax.f32 %v786_v18, 0.0 }
 0x136   : > { %v4924_v21 = vpack.c.bf16 %v989_v15, %v988_v14  ;;  %4075 = vmatpush3.bf16.msra.mxu1 %v4616_v55  ;;  %v4631_v55 = vld [vmem:[%s5367_s2 + $0xd8] sm:$0xff]   ;;  %v4633_v15 = vld [vmem:[%s5367_s2 + $0xe0] sm:$0xff]  }
 0x137   : > { %v4926_v22 = vpack.c.bf16 %v987_v20, %v986_v19  ;;  %4076 = vmatprep.subr.bf16.mxu1 %v4617_v13 }
 0x139   : > { %v3998_v24 = vpop.f32.mrb[32].mxu0  ;;  %4061 = vmatmul.mubr.bf16.gmra.mrb[8].mxu1 %v4926_v22 }
 0x13a   : > { %4077 = vmatpush3.bf16.msra.mxu1 %v4617_v13  ;;  %v799_v25 = vpop.f32.mrb[33].mxu0  ;;  %4064 = vmatprep.mubr.bf16.mxu1 %v4924_v21  ;;  %v992_v30 = vmax.f32 %v3998_v24, 0.0 }
 0x13b   : > { %v3999_v28 = vpop.f32.mrb[34].mxu0  ;;  %4078 = vmatprep.subr.bf16.mxu1 %v4619_v23  ;;  %v990_v33 = vmax.f32 %v799_v25, 0.0  ;;  %v4634_v25 = vld [vmem:[%s5367_s2 + $0xa0] sm:$0xff]  }
 0x13c   : > { %v993_v31 = vmax.f32 %v3999_v28, 0.0  ;;  %v802_v32 = vpop.f32.mrb[35].mxu0  ;;  %v4635_v28 = vld [vmem:[%s5367_s2 + $0xe8] sm:$0xff]  }
 0x13d   : > { %v991_v34 = vmax.f32 %v802_v32, 0.0 }
 0x13e   : > { %v4936_v35 = vpack.c.bf16 %v993_v31, %v992_v30  ;;  %4079 = vmatpush3.bf16.msra.mxu1 %v4619_v23  ;;  %v4636_v30 = vld [vmem:[%s5367_s2 + $0xa8] sm:$0xff]  }
 0x13f   : > { %v4938_v38 = vpack.c.bf16 %v991_v34, %v990_v33  ;;  %4080 = vmatprep.subr.bf16.mxu1 %v4621_v29 }
 0x141   : > { %v4002_v40 = vpop.f32.mrb[36].mxu0  ;;  %4065 = vmatmul.mubr.bf16.gmra.mrb[12].mxu1 %v4938_v38 }
 0x142   : > { %v996_v41 = vmax.f32 %v4002_v40, 0.0  ;;  %4081 = vmatpush3.bf16.msra.mxu1 %v4621_v29  ;;  %v815_v42 = vpop.f32.mrb[37].mxu0  ;;  %4084 = vmatprep.mubr.bf16.mxu1 %v4883_v7 }
 0x143   : > { %v994_v43 = vmax.f32 %v815_v42, 0.0  ;;  %v4003_v44 = vpop.f32.mrb[38].mxu0  ;;  %4082 = vmatprep.subr.bf16.mxu1 %v4623_v39 }
 0x144   : > { %v997_v46 = vmax.f32 %v4003_v44, 0.0  ;;  %v818_v48 = vpop.f32.mrb[39].mxu0 }
 0x145   : > { %v995_v49 = vmax.f32 %v818_v48, 0.0  ;;  %v4640_v48 = vld [vmem:[%s5367_s2 + $0xb8] sm:$0xff]  }
 0x146   : > { %v4948_v50 = vpack.c.bf16 %v997_v46, %v996_v41  ;;  %4083 = vmatpush3.bf16.msra.mxu1 %v4623_v39  ;;  %v4637_v39 = vld [vmem:[%s5367_s2 + $0xf0] sm:$0xff]   ;;  %v4639_v46 = vld [vmem:[%s5367_s2 + $0xf8] sm:$0xff]  }
 0x147   : > { %v4950_v51 = vpack.c.bf16 %v995_v49, %v994_v43  ;;  %4100 = vmatprep.subr.bf16.mxu1 %v4625_v45 }
 0x149   : > { %v4006_v53 = vpop.f32.mrb[40].mxu0  ;;  %4085 = vmatmul.mubr.bf16.vlgmr.msra.gmra.mrb[0].mxu1 %v4881_v6  ;;  %4244 = vmatprep.mubr.bf16.mxu0 %v4950_v51 }
 0x14a   : > { %v1000_v56 = vmax.f32 %v4006_v53, 0.0  ;;  %4101 = vmatpush3.bf16.msra.mxu1 %v4625_v45  ;;  %v831_v59 = vpop.f32.mrb[41].mxu0  ;;  %4088 = vmatprep.mubr.bf16.mxu1 %v4887_v17  ;;  %v4638_v45 = vld [vmem:[%s5367_s2 + $0xb0] sm:$0xff]  }
 0x14b   : > { %v998_v60 = vmax.f32 %v831_v59, 0.0  ;;  %4245 = vmatmul.mubr.bf16.vlgmr.msra.gmra.mrb[72].mxu0 %v4948_v50  ;;  %v4007_v62 = vpop.f32.mrb[42].mxu0  ;;  %4102 = vmatprep.subr.bf16.mxu1 %v4627_v52 }
 0x14c   : > { %v1001_v0 = vmax.f32 %v4007_v62, 0.0  ;;  %4261 = vmatpush3.bf16.msra.mxu0 %v4878_v61  ;;  %v834_v1 = vpop.f32.mrb[43].mxu0  ;;  %v4632_v61 = vld [vmem:[%s5367_s2 + $0x98] sm:$0xff]  }
 0x14d   : > { %v999_v2 = vmax.f32 %v834_v1, 0.0  ;;  %4262 = vmatprep.subr.bf16.mxu0 %v4628_v54 }
 0x14e   : > { %v4966_v3 = vpack.c.bf16 %v1001_v0, %v1000_v56  ;;  %4103 = vmatpush3.bf16.msra.mxu1 %v4627_v52 }
 0x14f   : > { %v4968_v4 = vpack.c.bf16 %v999_v2, %v998_v60  ;;  %4104 = vmatprep.subr.bf16.mxu1 %v4629_v63 }
 0x150   : > { %4263 = vmatpush3.bf16.msra.mxu0 %v4628_v54  ;;  %v4641_v54 = vld [vmem:[%s5367_s2 + $0x100] sm:$0xff]  }
 0x151   : > { %v4010_v10 = vpop.f32.mrb[44].mxu0  ;;  %4089 = vmatmul.mubr.bf16.gmra.mrb[4].mxu1 %v4885_v16  ;;  %4248 = vmatprep.mubr.bf16.mxu0 %v4968_v4 }
 0x152   : > { %v1004_v11 = vmax.f32 %v4010_v10, 0.0  ;;  %4105 = vmatpush3.bf16.msra.mxu1 %v4629_v63  ;;  %v847_v12 = vpop.f32.mrb[45].mxu0  ;;  %4092 = vmatprep.mubr.bf16.mxu1 %v4891_v27  ;;  %v4643_v63 = vld [vmem:[%s5367_s2 + $0x108] sm:$0xff]  }
 0x153   : > { %v1002_v13 = vmax.f32 %v847_v12, 0.0  ;;  %4249 = vmatmul.mubr.bf16.gmra.mrb[76].mxu0 %v4966_v3  ;;  %4264 = vmatprep.subr.bf16.mxu0 %v4630_v5  ;;  %v4011_v14 = vpop.f32.mrb[46].mxu0 }
 0x154   : > { %v1005_v18 = vmax.f32 %v4011_v14, 0.0  ;;  %4265 = vmatpush3.bf16.msra.mxu0 %v4630_v5  ;;  %v850_v19 = vpop.f32.mrb[47].mxu0  ;;  %4106 = vmatprep.subr.bf16.mxu1 %v4631_v55  ;;  %v4645_v5 = vld [vmem:[%s5367_s2 + $0x110] sm:$0xff]  }
 0x155   : > { %v1003_v20 = vmax.f32 %v850_v19, 0.0  ;;  %4266 = vmatprep.subr.bf16.mxu0 %v4632_v61 }
 0x156   : > { %v4986_v23 = vpack.c.bf16 %v1005_v18, %v1004_v11  ;;  %4107 = vmatpush3.bf16.msra.mxu1 %v4631_v55 }
 0x157   : > { %v4988_v24 = vpack.c.bf16 %v1003_v20, %v1002_v13  ;;  %4108 = vmatprep.subr.bf16.mxu1 %v4633_v15  ;;  %v4647_v13 = vld [vmem:[%s5367_s2 + $0x118] sm:$0xff]  }
 0x158   : > { %4267 = vmatpush3.bf16.msra.mxu0 %v4632_v61 }
 0x159   : > { %v4014_v29 = vpop.f32.mrb[48].mxu0  ;;  %4093 = vmatmul.mubr.bf16.gmra.mrb[8].mxu1 %v4889_v26  ;;  %4252 = vmatprep.mubr.bf16.mxu0 %v4988_v24 }
 0x15a   : > { %v1008_v31 = vmax.f32 %v4014_v29, 0.0  ;;  %4109 = vmatpush3.bf16.msra.mxu1 %v4633_v15  ;;  %v863_v32 = vpop.f32.mrb[49].mxu0  ;;  %4096 = vmatprep.mubr.bf16.mxu1 %v4895_v37  ;;  %v4648_v15 = vld [vmem:[%s5367_s2 + $0x218] sm:$0xff]  }
 0x15b   : > { %v1006_v33 = vmax.f32 %v863_v32, 0.0  ;;  %4253 = vmatmul.mubr.bf16.gmra.mrb[80].mxu0 %v4986_v23  ;;  %4268 = vmatprep.subr.bf16.mxu0 %v4634_v25  ;;  %v4015_v34 = vpop.f32.mrb[50].mxu0 }
 0x15c   : > { %v1009_v40 = vmax.f32 %v4015_v34, 0.0  ;;  %4269 = vmatpush3.bf16.msra.mxu0 %v4634_v25  ;;  %v866_v41 = vpop.f32.mrb[51].mxu0  ;;  %4110 = vmatprep.subr.bf16.mxu1 %v4635_v28  ;;  %v4649_v25 = vld [vmem:[%s5367_s2 + $0x120] sm:$0xff]  }
 0x15d   : > { %v1007_v42 = vmax.f32 %v866_v41, 0.0  ;;  %4270 = vmatprep.subr.bf16.mxu0 %v4636_v30 }
 0x15e   : > { %v5006_v43 = vpack.c.bf16 %v1009_v40, %v1008_v31  ;;  %4111 = vmatpush3.bf16.msra.mxu1 %v4635_v28 }
 0x15f   : > { %v5008_v44 = vpack.c.bf16 %v1007_v42, %v1006_v33  ;;  %4112 = vmatprep.subr.bf16.mxu1 %v4637_v39  ;;  %v4651_v33 = vld [vmem:[%s5367_s2 + $0x128] sm:$0xff]  }
 0x160   : > { %4271 = vmatpush3.bf16.msra.mxu0 %v4636_v30 }
 0x161   : > { %4097 = vmatmul.mubr.bf16.gmra.mrb[12].mxu1 %v4893_v36  ;;  %4256 = vmatprep.mubr.bf16.mxu0 %v5008_v44  ;;  %v4018_v49 = vpop.f32.mrb[52].mxu0 }
 0x162   : > { %4113 = vmatpush3.bf16.msra.mxu1 %v4637_v39  ;;  %4116 = vmatprep.mubr.bf16.mxu1 %v4950_v51  ;;  %v1012_v52 = vmax.f32 %v4018_v49, 0.0  ;;  %v879_v53 = vpop.f32.mrb[53].mxu0  ;;  %v4642_v51 = vld [vmem:[%s5367_s2 + $0x200] sm:$0xff]   ;;  %v4652_v39 = vld [vmem:[%s5367_s2 + $0x228] sm:$0xff]  }
 0x163   : > { %4257 = vmatmul.mubr.bf16.gmra.mrb[84].mxu0 %v5006_v43  ;;  %4272 = vmatprep.subr.bf16.mxu0 %v4638_v45  ;;  %v4019_v56 = vpop.f32.mrb[54].mxu0 }
 0x164   : > { %4273 = vmatpush3.bf16.msra.mxu0 %v4638_v45  ;;  %4276 = vmatprep.mubr.bf16.mxu0 %v4883_v7  ;;  %v1013_v59 = vmax.f32 %v4019_v56, 0.0  ;;  %v882_v60 = vpop.f32.mrb[55].mxu0  ;;  %v4644_v7 = vld [vmem:[%s5367_s2 + $0x208] sm:$0xff]   ;;  %v4653_v45 = vld [vmem:[%s5367_s2 + $0x130] sm:$0xff]  }
 0x165   : > { %4114 = vmatprep.subr.bf16.mxu1 %v4639_v46  ;;  %4274 = vmatprep.subr.bf16.mxu0 %v4640_v48 }
 0x166   : > { %4115 = vmatpush3.bf16.msra.mxu1 %v4639_v46  ;;  %v5030_v62 = vpack.c.bf16 %v1013_v59, %v1012_v52  ;;  %v4656_v59 = vld [vmem:[%s5367_s2 + $0x238] sm:$0xff]  }
 0x167   : > { %4132 = vmatprep.subr.bf16.mxu1 %v4641_v54 }
 0x168   : > { %4275 = vmatpush3.bf16.msra.mxu0 %v4640_v48 }
 0x169   : > { %4117 = vmatmul.mubr.bf16.vlgmr.msra.gmra.mrb[0].mxu1 %v4948_v50  ;;  %4292 = vmatprep.subr.bf16.mxu0 %v4642_v51  ;;  %v4022_v0 = vpop.f32.mrb[56].mxu0 }
 0x16a   : > { %4133 = vmatpush3.bf16.msra.mxu1 %v4641_v54  ;;  %4120 = vmatprep.mubr.bf16.mxu1 %v4968_v4  ;;  %v1016_v1 = vmax.f32 %v4022_v0, 0.0  ;;  %v895_v2 = vpop.f32.mrb[57].mxu0  ;;  %v4646_v4 = vld [vmem:[%s5367_s2 + $0x210] sm:$0xff]   ;;  %v4655_v54 = vld [vmem:[%s5367_s2 + $0x138] sm:$0xff]  }
 0x16b   : > { %4277 = vmatmul.mubr.bf16.vlgmr.msra.gmra.mrb[72].mxu0 %v4881_v6  ;;  %4134 = vmatprep.subr.bf16.mxu1 %v4643_v63  ;;  %v1014_v55 = vmax.f32 %v895_v2, 0.0  ;;  %v4023_v50 = vpop.f32.mrb[58].mxu0 }
 0x16c   : > { %4280 = vmatprep.mubr.bf16.mxu0 %v4887_v17  ;;  %4293 = vmatpush3.bf16.msra.mxu0 %v4642_v51  ;;  %v1017_v10 = vmax.f32 %v4023_v50, 0.0  ;;  %v898_v61 = vpop.f32.mrb[59].mxu0  ;;  %v4661_v50 = vld [vmem:[%s5367_s2 + $0x1a0] sm:$0xff]  }
 0x16d   : > { %4294 = vmatprep.subr.bf16.mxu0 %v4644_v7  ;;  %v1015_v11 = vmax.f32 %v898_v61, 0.0  ;;  %v4663_v61 = vld [vmem:[%s5367_s2 + $0x1b0] sm:$0xff]  }
 0x16e   : > { %4135 = vmatpush3.bf16.msra.mxu1 %v4643_v63  ;;  %v5048_v12 = vpack.c.bf16 %v1017_v10, %v1016_v1  ;;  %v4657_v63 = vld [vmem:[%s5367_s2 + $0x180] sm:$0xff]   ;;  %v4662_v10 = vld [vmem:[%s5367_s2 + $0x1a8] sm:$0xff]  }
 0x16f   : > { %4136 = vmatprep.subr.bf16.mxu1 %v4645_v5  ;;  %v5053_v14 = vpack.c.bf16 %v1015_v11, %v1014_v55  ;;  %v4660_v55 = vld [vmem:[%s5367_s2 + $0x198] sm:$0xff]   ;;  %v4665_v11 = vld [vmem:[%s5367_s2 + $0x1c0] sm:$0xff]  }
 0x170   : > { %4295 = vmatpush3.bf16.msra.mxu0 %v4644_v7 }
 0x171   : > { %4121 = vmatmul.mubr.bf16.gmra.mrb[4].mxu1 %v4966_v3  ;;  %4296 = vmatprep.subr.bf16.mxu0 %v4646_v4  ;;  %v4026_v18 = vpop.f32.mrb[60].mxu0 }
 0x172   : > { %4137 = vmatpush3.bf16.msra.mxu1 %v4645_v5  ;;  %4124 = vmatprep.mubr.bf16.mxu1 %v4988_v24  ;;  %v1020_v19 = vmax.f32 %v4026_v18, 0.0  ;;  %v911_v20 = vpop.f32.mrb[61].mxu0  ;;  %v4650_v24 = vld [vmem:[%s5367_s2 + $0x220] sm:$0xff]   ;;  %v4659_v5 = vld [vmem:[%s5367_s2 + $0x190] sm:$0xff]  }
 0x173   : > { %4281 = vmatmul.mubr.bf16.gmra.mrb[76].mxu0 %v4885_v16  ;;  %4138 = vmatprep.subr.bf16.mxu1 %v4647_v13  ;;  %v1018_v28 = vmax.f32 %v911_v20, 0.0  ;;  %v4027_v3 = vpop.f32.mrb[62].mxu0  ;;  %v5236_v18 = vld [vmem:[%s5371_s6 + $0x30] sm:$0xff]   ;;  %v5246_v20 = vld [vmem:[%s5371_s6 + $0x38] sm:$0xff]  }
 0x174   : > { %4284 = vmatprep.mubr.bf16.mxu0 %v4891_v27  ;;  %4297 = vmatpush3.bf16.msra.mxu0 %v4646_v4  ;;  %v1021_v29 = vmax.f32 %v4027_v3, 0.0  ;;  %v914_v30 = vpop.f32.mrb[63].mxu0  ;;  %v4664_v4 = vld [vmem:[%s5367_s2 + $0x1b8] sm:$0xff]   ;;  %v2710_v3 = vlaneseq }
 0x175   : > { %4298 = vmatprep.subr.bf16.mxu0 %v4648_v15  ;;  %v1019_v31 = vmax.f32 %v914_v30, 0.0 }
 0x176   : > { %4139 = vmatpush3.bf16.msra.mxu1 %v4647_v13  ;;  %v5068_v32 = vpack.c.bf16 %v1021_v29, %v1020_v19  ;;  %v4668_v13 = vld [vmem:[%s5367_s2 + $0x1d8] sm:$0xff]   ;;  %v2711_v29 = vshrl.u32 %v2710_v3, 7 }
 0x177   : > { %4140 = vmatprep.subr.bf16.mxu1 %v4649_v25  ;;  %v1060_v34 = vpack.c.bf16 %v1019_v31, %v1018_v28  ;;  %v4687_v19 = vld [vmem:[%s5369_s4 + $0x38] sm:$0xff]   ;;  %v4690_v28 = vld [vmem:[%s4771_s15 + $0xe0] sm:$0xff]  }
 0x178   : > { %4299 = vmatpush3.bf16.msra.mxu0 %v4648_v15  ;;  %v4685_v15 = vld [vmem:[%s5369_s4 + $0x30] sm:$0xff]   ;;  %vm2712_vm0 = vcmp.lt.s32.totalorder %v2711_v29, 7 }
 0x179   : > { %4125 = vmatmul.mubr.bf16.gmra.mrb[8].mxu1 %v4986_v23  ;;  %4300 = vmatprep.subr.bf16.mxu0 %v4650_v24  ;;  %v4030_v40 = vpop.f32.mrb[64].mxu0 }
 0x17a   : > { %4141 = vmatpush3.bf16.msra.mxu1 %v4649_v25  ;;  %4128 = vmatprep.mubr.bf16.mxu1 %v5008_v44  ;;  %v1024_v41 = vmax.f32 %v4030_v40, 0.0  ;;  %v927_v42 = vpop.f32.mrb[65].mxu0  ;;  %v4654_v44 = vld [vmem:[%s5367_s2 + $0x230] sm:$0xff]   ;;  %v4689_v25 = vld [vmem:[%s4771_s15 + $0xd8] sm:$0xff]  }
 0x17b   : > { %4285 = vmatmul.mubr.bf16.gmra.mrb[80].mxu0 %v4889_v26  ;;  %4142 = vmatprep.subr.bf16.mxu1 %v4651_v33  ;;  %v1022_v46 = vmax.f32 %v927_v42, 0.0  ;;  %v4031_v23 = vpop.f32.mrb[66].mxu0 }
 0x17c   : > { %4288 = vmatprep.mubr.bf16.mxu0 %v4895_v37  ;;  %4301 = vmatpush3.bf16.msra.mxu0 %v4650_v24  ;;  %v1025_v48 = vmax.f32 %v4031_v23, 0.0  ;;  %v930_v49 = vpop.f32.mrb[67].mxu0 }
 0x17d   : > { %4302 = vmatprep.subr.bf16.mxu0 %v4652_v39  ;;  %v1023_v52 = vmax.f32 %v930_v49, 0.0 }
 0x17e   : > { %4143 = vmatpush3.bf16.msra.mxu1 %v4651_v33  ;;  %v1063_v53 = vpack.c.bf16 %v1025_v48, %v1024_v41 }
 0x17f   : > { %4144 = vmatprep.subr.bf16.mxu1 %v4653_v45  ;;  %v1062_v56 = vpack.c.bf16 %v1023_v52, %v1022_v46 }
 0x180   : > { %4303 = vmatpush3.bf16.msra.mxu0 %v4652_v39 }
 0x181   : > { %4129 = vmatmul.mubr.bf16.gmra.mrb[12].mxu1 %v5006_v43  ;;  %4304 = vmatprep.subr.bf16.mxu0 %v4654_v44  ;;  %v4034_v60 = vpop.f32.mrb[68].mxu0 }
 0x182   : > { %4145 = vmatpush3.bf16.msra.mxu1 %v4653_v45  ;;  %4148 = vmatprep.mubr.bf16.mxu1 %v5030_v62  ;;  %v943_v51 = vpop.f32.mrb[69].mxu0  ;;  %v4658_v62 = vld [vmem:[%s5367_s2 + $0x188] sm:$0xff]  }
 0x183   : > { %4289 = vmatmul.mubr.bf16.gmra.mrb[84].mxu0 %v4893_v36  ;;  %4146 = vmatprep.subr.bf16.mxu1 %v4655_v54  ;;  %v1026_v7 = vmax.f32 %v943_v51, 0.0  ;;  %v4035_v0 = vpop.f32.mrb[70].mxu0 }
 0x184   : > { %4305 = vmatpush3.bf16.msra.mxu0 %v4654_v44  ;;  %4308 = vmatprep.mubr.bf16.mxu0 %v4881_v6  ;;  %v946_v43 = vpop.f32.mrb[71].mxu0 }
 0x185   : > { %4306 = vmatprep.subr.bf16.mxu0 %v4656_v59  ;;  %v1027_v1 = vmax.f32 %v946_v43, 0.0 }
 0x186   : > { %4147 = vmatpush3.bf16.msra.mxu1 %v4655_v54 }
 0x187   : > { %4164 = vmatprep.subr.bf16.mxu1 %v4657_v63  ;;  %v1064_v2 = vpack.c.bf16 %v1027_v1, %v1026_v7 }
 0x188   : > { %4307 = vmatpush3.bf16.msra.mxu0 %v4656_v59 }
 0x189   : > { %4149 = vmatmul.mubr.bf16.vlgmr.msra.gmra.mrb[0].mxu1 %v5053_v14  ;;  %v5226_v14 = vld [vmem:[%s5371_s6 + $0x28] sm:$0xff]  }
 0x18a   : > { %4165 = vmatpush3.bf16.msra.mxu1 %v4657_v63  ;;  %4152 = vmatprep.mubr.bf16.mxu1 %v5048_v12  ;;  %v4666_v12 = vld [vmem:[%s5367_s2 + $0x1c8] sm:$0xff]  }
 0x18b   : > { %4309 = vmatmul.mubr.bf16.vlgmr.msra.gmra.mrb[72].mxu0 %v4887_v17  ;;  %4166 = vmatprep.subr.bf16.mxu1 %v4658_v62 }
 0x18c   : > { %4312 = vmatprep.mubr.bf16.mxu0 %v4885_v16 }
 0x18e   : > { %4167 = vmatpush3.bf16.msra.mxu1 %v4658_v62 }
 0x18f   : > { %4168 = vmatprep.subr.bf16.mxu1 %v4659_v5 }
 0x191   : > { %4153 = vmatmul.mubr.bf16.gmra.mrb[4].mxu1 %v1060_v34 }
 0x192   : > { %4169 = vmatpush3.bf16.msra.mxu1 %v4659_v5  ;;  %4156 = vmatprep.mubr.bf16.mxu1 %v5068_v32 }
 0x193   : > { %4313 = vmatmul.mubr.bf16.gmra.mrb[76].mxu0 %v4891_v27  ;;  %4170 = vmatprep.subr.bf16.mxu1 %v4660_v55 }
 0x194   : > { %4316 = vmatprep.mubr.bf16.mxu0 %v4889_v26 }
 0x196   : > { %4171 = vmatpush3.bf16.msra.mxu1 %v4660_v55 }
 0x197   : > { %4172 = vmatprep.subr.bf16.mxu1 %v4661_v50 }
 0x199   : > { %4157 = vmatmul.mubr.bf16.gmra.mrb[8].mxu1 %v1062_v56 }
 0x19a   : > { %4173 = vmatpush3.bf16.msra.mxu1 %v4661_v50  ;;  %4160 = vmatprep.mubr.bf16.mxu1 %v1063_v53 }
 0x19b   : > { %4317 = vmatmul.mubr.bf16.gmra.mrb[80].mxu0 %v4895_v37  ;;  %4174 = vmatprep.subr.bf16.mxu1 %v4662_v10 }
 0x19c   : > { %4320 = vmatprep.mubr.bf16.mxu0 %v4893_v36 }
 0x19e   : > { %4175 = vmatpush3.bf16.msra.mxu1 %v4662_v10 }
 0x19f   : > { %4176 = vmatprep.subr.bf16.mxu1 %v4663_v61 }
 0x1a1   : > { %4161 = vmatmul.mubr.bf16.gmra.mrb[12].mxu1 %v1064_v2 }
 0x1a2   : > { %4177 = vmatpush3.bf16.msra.mxu1 %v4663_v61  ;;  %4180 = vmatprep.mubr.bf16.mxu1 %v4881_v6  ;;  %v4667_v6 = vld [vmem:[%s5367_s2 + $0x1d0] sm:$0xff]  }
 0x1a3   : > { %4321 = vmatmul.mubr.bf16.gmra.mrb[84].mxu0 %v4897_v47  ;;  %4178 = vmatprep.subr.bf16.mxu1 %v4664_v4 }
 0x1a4   : > { %4372 = vmatprep.mubr.bf16.mxu0 %v4689_v25 }
 0x1a6   : > { %4179 = vmatpush3.bf16.msra.mxu1 %v4664_v4 }
 0x1a7   : > { %4196 = vmatprep.subr.bf16.mxu1 %v4665_v11 }
 0x1a9   : > { %4181 = vmatmul.mubr.bf16.vlgmr.msra.gmra.mrb[0].mxu1 %v4887_v17  ;;  %v4670_v17 = vld [vmem:[%s5367_s2 + $0x1e8] sm:$0xff]  }
 0x1aa   : > { %4197 = vmatpush3.bf16.msra.mxu1 %v4665_v11  ;;  %4184 = vmatprep.mubr.bf16.mxu1 %v4885_v16  ;;  %v4669_v16 = vld [vmem:[%s5367_s2 + $0x1e0] sm:$0xff]  }
 0x1ab   : > { %4198 = vmatprep.subr.bf16.mxu1 %v4666_v12 }
 0x1ae   : > { %4199 = vmatpush3.bf16.msra.mxu1 %v4666_v12 }
 0x1af   : > { %4200 = vmatprep.subr.bf16.mxu1 %v4667_v6 }
 0x1b1   : > { %4185 = vmatmul.mubr.bf16.gmra.mrb[4].mxu1 %v4891_v27  ;;  %v4672_v27 = vld [vmem:[%s5367_s2 + $0x1f8] sm:$0xff]  }
 0x1b2   : > { %4201 = vmatpush3.bf16.msra.mxu1 %v4667_v6  ;;  %4188 = vmatprep.mubr.bf16.mxu1 %v4889_v26  ;;  %v4671_v26 = vld [vmem:[%s5367_s2 + $0x1f0] sm:$0xff]  }
 0x1b3   : > { %4202 = vmatprep.subr.bf16.mxu1 %v4668_v13 }
 0x1b6   : > { %4203 = vmatpush3.bf16.msra.mxu1 %v4668_v13 }
 0x1b7   : > { %4204 = vmatprep.subr.bf16.mxu1 %v4669_v16 }
 0x1b9   : > { %4189 = vmatmul.mubr.bf16.gmra.mrb[8].mxu1 %v4895_v37  ;;  %v5176_v37 = vld [vmem:[%s5371_s6] sm:$0xff]  }
 0x1ba   : > { %4205 = vmatpush3.bf16.msra.mxu1 %v4669_v16  ;;  %4192 = vmatprep.mubr.bf16.mxu1 %v4893_v36  ;;  %v4673_v36 = vld [vmem:[%s5369_s4] sm:$0xff]  }
 0x1bb   : > { %4206 = vmatprep.subr.bf16.mxu1 %v4670_v17  ;;  %4356 = vmatprep.subr.bf16.mxu0 %v5176_v37 }
 0x1bc   : > { %4357 = vmatpush3.bf16.msra.mxu0 %v5176_v37 }
 0x1be   : > { %4207 = vmatpush3.bf16.msra.mxu1 %v4670_v17 }
 0x1bf   : > { %4208 = vmatprep.subr.bf16.mxu1 %v4671_v26 }
 0x1c1   : > { %4193 = vmatmul.mubr.bf16.gmra.mrb[12].mxu1 %v4897_v47  ;;  %v4675_v47 = vld [vmem:[%s5369_s4 + $0x8] sm:$0xff]  }
 0x1c2   : > { %4209 = vmatpush3.bf16.msra.mxu1 %v4671_v26  ;;  %4212 = vmatprep.mubr.bf16.mxu1 %v4901_v58  ;;  %v4677_v58 = vld [vmem:[%s5369_s4 + $0x10] sm:$0xff]  }
 0x1c3   : > { %4210 = vmatprep.subr.bf16.mxu1 %v4672_v27 }
 0x1c6   : > { %4211 = vmatpush3.bf16.msra.mxu1 %v4672_v27 }
 0x1c7   : > { %4324 = vmatprep.subr.bf16.mxu1 %v4673_v36 }
 0x1c9   : > { %4213 = vmatmul.mubr.bf16.vlgmr.msra.gmra.mrb[0].mxu1 %v4899_v57  ;;  %v5184_v57 = vld [vmem:[%s5371_s6 + $0x8] sm:$0xff]  }
 0x1ca   : > { %4216 = vmatprep.mubr.bf16.mxu1 %v4914_v9  ;;  %4325 = vmatpush3.bf16.msra.mxu1 %v4673_v36  ;;  %v4679_v9 = vld [vmem:[%s5369_s4 + $0x18] sm:$0xff]  }
 0x1cb   : > { %4326 = vmatprep.subr.bf16.mxu1 %v4675_v47  ;;  %4358 = vmatprep.subr.bf16.mxu0 %v5184_v57 }
 0x1cc   : > { %4359 = vmatpush3.bf16.msra.mxu0 %v5184_v57 }
 0x1ce   : > { %4327 = vmatpush3.bf16.msra.mxu1 %v4675_v47 }
 0x1cf   : > { %4328 = vmatprep.subr.bf16.mxu1 %v4677_v58 }
 0x1d1   : > { %4217 = vmatmul.mubr.bf16.gmra.mrb[4].mxu1 %v4912_v8  ;;  %v5195_v8 = vld [vmem:[%s5371_s6 + $0x10] sm:$0xff]  }
 0x1d2   : > { %4220 = vmatprep.mubr.bf16.mxu1 %v4926_v22  ;;  %4360 = vmatprep.subr.bf16.mxu0 %v5195_v8  ;;  %v4681_v22 = vld [vmem:[%s5369_s4 + $0x20] sm:$0xff]  }
 0x1d3   : > { %4329 = vmatpush3.bf16.msra.mxu1 %v4677_v58  ;;  %4361 = vmatpush3.bf16.msra.mxu0 %v5195_v8 }
 0x1d4   : > { %4330 = vmatprep.subr.bf16.mxu1 %v4679_v9 }
 0x1d7   : > { %4331 = vmatpush3.bf16.msra.mxu1 %v4679_v9 }
 0x1d8   : > { %4332 = vmatprep.subr.bf16.mxu1 %v4681_v22 }
 0x1d9   : > { %4221 = vmatmul.mubr.bf16.gmra.mrb[8].mxu1 %v4924_v21  ;;  %v5205_v21 = vld [vmem:[%s5371_s6 + $0x18] sm:$0xff]  }
 0x1da   : > { %4224 = vmatprep.mubr.bf16.mxu1 %v4938_v38  ;;  %4362 = vmatprep.subr.bf16.mxu0 %v5205_v21  ;;  %v4683_v38 = vld [vmem:[%s5369_s4 + $0x28] sm:$0xff]  }
 0x1db   : > { %4363 = vmatpush3.bf16.msra.mxu0 %v5205_v21  ;;  %4333 = vmatpush3.bf16.msra.mxu1 %v4681_v22  ;;  %v5282_v22 = vld [vmem:[%s5368_s3] ss:$0 sm:$0xff] }
 0x1dc   : > { %4334 = vmatprep.subr.bf16.mxu1 %v4683_v38 }
 0x1df   : > { %4335 = vmatpush3.bf16.msra.mxu1 %v4683_v38 }
 0x1e0   : > { %4336 = vmatprep.subr.bf16.mxu1 %v4685_v15 }
 0x1e1   : > { %4225 = vmatmul.mubr.bf16.gmra.mrb[12].mxu1 %v4936_v35  ;;  %v5215_v35 = vld [vmem:[%s5371_s6 + $0x20] sm:$0xff]  }
 0x1e2   : > { %4364 = vmatprep.subr.bf16.mxu0 %v5215_v35 }
 0x1e3   : > { %4365 = vmatpush3.bf16.msra.mxu0 %v5215_v35  ;;  %4337 = vmatpush3.bf16.msra.mxu1 %v4685_v15 }
 0x1e4   : > { %4366 = vmatprep.subr.bf16.mxu0 %v5226_v14  ;;  %4338 = vmatprep.subr.bf16.mxu1 %v4687_v19 }
 0x1e7   : > { %4367 = vmatpush3.bf16.msra.mxu0 %v5226_v14  ;;  %4339 = vmatpush3.bf16.msra.mxu1 %v4687_v19 }
 0x1e8   : > { %4368 = vmatprep.subr.bf16.mxu0 %v5236_v18  ;;  %4388 = vmatprep.subr.bf16.mxu1 %v5176_v37 }
 0x1eb   : > { %4369 = vmatpush3.bf16.msra.mxu0 %v5236_v18 }
 0x1ec   : > { %4370 = vmatprep.subr.bf16.mxu0 %v5246_v20 }
 0x1ef   : > { %4371 = vmatpush3.bf16.msra.mxu0 %v5246_v20 }
 0x1f2   : > { %4373 = vmatmul.mubr.bf16.vlgmr.msra.gmra.mrb[88].mxu0 %v4690_v28 }
 0x25e   : > { %v4310_v30 = vpop.f32.mrb[72].mxu0 }
 0x25f   : > { %v2615_v24 = vpop.f32.mrb[73].mxu0  ;;  %v2696_v32 = vrot.slane %v4310_v30, 1 }
 0x260   : > { %v4311_v31 = vpop.f32.mrb[74].mxu0  ;;  %v2694_v39 = vrot.slane %v2615_v24, 1 }
 0x261   : > { %v2697_v33 = vrot.slane %v4311_v31, 1  ;;  %v2618_v34 = vpop.f32.mrb[75].mxu0 }
 0x262   : > { %v2695_v40 = vrot.slane %v2618_v34, 1 }
 0x263   : > { %v2725_v41 = vsel %vm2712_vm0, %v2696_v32, %v2697_v33 }
 0x264   : > { %v2727_v42 = vsel %vm2712_vm0, %v2694_v39, %v2695_v40  ;;  %v2726_v45 = vsel %vm2712_vm0, %v2695_v40, %v2696_v32 }
 0x266   : > { %v4314_v46 = vpop.f32.mrb[76].mxu0 }
 0x267   : > { %v2631_v23 = vpop.f32.mrb[77].mxu0  ;;  %v2700_v44 = vrot.slane %v4314_v46, 1 }
 0x268   : > { %v2698_v48 = vrot.slane %v2631_v23, 1  ;;  %v4315_v49 = vpop.f32.mrb[78].mxu0 }
 0x269   : > { %v2701_v52 = vrot.slane %v4315_v49, 1  ;;  %v2634_v53 = vpop.f32.mrb[79].mxu0 }
 0x26a   : > { %v2699_v54 = vrot.slane %v2634_v53, 1  ;;  %v2724_v56 = vsel %vm2712_vm0, %v2697_v33, %v2698_v48 }
 0x26b   : > { %v2721_v59 = vsel %vm2712_vm0, %v2700_v44, %v2701_v52 }
 0x26c   : > { %v2723_v60 = vsel %vm2712_vm0, %v2698_v48, %v2699_v54  ;;  %v2722_v51 = vsel %vm2712_vm0, %v2699_v54, %v2700_v44 }
 0x26e   : > { %v4318_v63 = vpop.f32.mrb[80].mxu0 }
 0x26f   : > { %v2647_v7 = vpop.f32.mrb[81].mxu0  ;;  %v2704_v1 = vrot.slane %v4318_v63, 1 }
 0x270   : > { %v2702_v0 = vrot.slane %v2647_v7, 1  ;;  %v4319_v43 = vpop.f32.mrb[82].mxu0 }
 0x271   : > { %v2705_v62 = vrot.slane %v4319_v43, 1  ;;  %v2650_v2 = vpop.f32.mrb[83].mxu0 }
 0x272   : > { %v2703_v5 = vrot.slane %v2650_v2, 1  ;;  %v2720_v55 = vsel %vm2712_vm0, %v2701_v52, %v2702_v0 }
 0x273   : > { %v2717_v50 = vsel %vm2712_vm0, %v2704_v1, %v2705_v62 }
 0x274   : > { %v2719_v10 = vsel %vm2712_vm0, %v2702_v0, %v2703_v5  ;;  %v5264_v61 = vsel %vm2712_vm0, %v2703_v5, %v2704_v1 }
 0x276   : > { %v4322_v4 = vpop.f32.mrb[84].mxu0 }
 0x277   : > { %v2663_v11 = vpop.f32.mrb[85].mxu0  ;;  %v2708_v13 = vrot.slane %v4322_v4, 1 }
 0x278   : > { %v2706_v12 = vrot.slane %v2663_v11, 1  ;;  %v4323_v6 = vpop.f32.mrb[86].mxu0 }
 0x279   : > { %v2709_v16 = vrot.slane %v4323_v6, 1  ;;  %v2666_v17 = vpop.f32.mrb[87].mxu0 }
 0x27a   : > { %v2707_v26 = vrot.slane %v2666_v17, 1  ;;  %v2716_v27 = vsel %vm2712_vm0, %v2705_v62, %v2706_v12 }
 0x27b   : > { %v5268_v36 = vsel %vm2712_vm0, %v2708_v13, %v2709_v16  ;;  %v5271_v47 = vsel %vm2712_vm0, %v2709_v16, %v2694_v39 }
 0x27c   : > { %v5274_v58 = vsel %vm2712_vm0, %v2706_v12, %v2707_v26  ;;  %v5277_v9 = vsel %vm2712_vm0, %v2707_v26, %v2708_v13 }
 0x29c   : > { %v4214_v38 = vpop.f32.mrb[0].mxu1 }
 0x29d   : > { %v2731_v15 = vadd.f32 %v4214_v38, %v2725_v41  ;;  %v2113_v19 = vpop.f32.mrb[1].mxu1 }
 0x29e   : > { %v2729_v25 = vadd.f32 %v2727_v42, %v2113_v19  ;;  %v4215_v28 = vpop.f32.mrb[2].mxu1 }
 0x29f   : > { %v2753_v3 = vadd.f32 %v5282_v22, %v2731_v15  ;;  %v2732_v30 = vadd.f32 %v4215_v28, %v2724_v56  ;;  %v2116_v24 = vpop.f32.mrb[3].mxu1 }
 0x2a0   : > { %v2751_v31 = vadd.f32 %v5282_v22, %v2729_v25  ;;  %v2730_v32 = vadd.f32 %v2726_v45, %v2116_v24 }
 0x2a1   : > { %v2754_v29 = vadd.f32 %v5282_v22, %v2732_v30  ;;  %v2769_v34 = vmax.f32 %v2753_v3, 0.0 }
 0x2a2   : > { %v2752_v33 = vadd.f32 %v5282_v22, %v2730_v32  ;;  %v2767_v40 = vmax.f32 %v2751_v31, 0.0 }
 0x2a3   : > { %v2770_v39 = vmax.f32 %v2754_v29, 0.0 }
 0x2a4   : > { %v2768_v46 = vmax.f32 %v2752_v33, 0.0  ;;  %v4218_v23 = vpop.f32.mrb[4].mxu1 }
 0x2a5   : > { %v2784_v41 = vpack.c.bf16 %v2770_v39, %v2769_v34  ;;  %v2735_v48 = vadd.f32 %v4218_v23, %v2721_v59  ;;  %v2129_v42 = vpop.f32.mrb[5].mxu1  ;;  %v4691_v39 = vld [vmem:[%s4771_s15 + $0xe8] sm:$0xff]  }
 0x2a6   : > { %v2733_v49 = vadd.f32 %v2723_v60, %v2129_v42  ;;  %v4219_v44 = vpop.f32.mrb[6].mxu1  ;;  %v2783_v52 = vpack.c.bf16 %v2768_v46, %v2767_v40  ;;  %v4695_v40 = vld [vmem:[%s4771_s15 + $0x108] sm:$0xff]   ;;  %v4696_v46 = vld [vmem:[%s4771_s15 + $0x110] sm:$0xff]   ;;  %v5330_v42 = vld [vmem:[%s5370_s5] ss:$0 sm:$0xff] }
 0x2a7   : > { %v2757_v53 = vadd.f32 %v5282_v22, %v2735_v48  ;;  %v2736_v54 = vadd.f32 %v4219_v44, %v2720_v55  ;;  %v2132_v56 = vpop.f32.mrb[7].mxu1 }
 0x2a8   : > { %v2755_v45 = vadd.f32 %v5282_v22, %v2733_v49  ;;  %v2734_v63 = vadd.f32 %v2722_v51, %v2132_v56  ;;  %4340 = vmatprep.mubr.bf16.mxu1 %v2783_v52 }
 0x2a9   : > { %v2758_v7 = vadd.f32 %v5282_v22, %v2736_v54  ;;  %4341 = vmatmul.mubr.bf16.vlgmr.msra.gmra.mrb[16].mxu1 %v2784_v41  ;;  %v2773_v59 = vmax.f32 %v2757_v53, 0.0 }
 0x2aa   : > { %v2756_v0 = vadd.f32 %v5282_v22, %v2734_v63  ;;  %4396 = vmatpush3.bf16.msra.mxu1 %v5176_v37  ;;  %v2771_v60 = vmax.f32 %v2755_v45, 0.0 }
 0x2ab   : > { %v2774_v43 = vmax.f32 %v2758_v7, 0.0  ;;  %4389 = vmatprep.subr.bf16.mxu1 %v5184_v57 }
 0x2ac   : > { %v2772_v1 = vmax.f32 %v2756_v0, 0.0  ;;  %v4222_v62 = vpop.f32.mrb[8].mxu1 }
 0x2ad   : > { %v2739_v2 = vadd.f32 %v4222_v62, %v2717_v50  ;;  %v2145_v5 = vpop.f32.mrb[9].mxu1  ;;  %v2786_v55 = vpack.c.bf16 %v2774_v43, %v2773_v59 }
 0x2ae   : > { %v2737_v4 = vadd.f32 %v2719_v10, %v2145_v5  ;;  %4397 = vmatpush3.bf16.msra.mxu1 %v5184_v57  ;;  %v4223_v51 = vpop.f32.mrb[10].mxu1  ;;  %v2785_v11 = vpack.c.bf16 %v2772_v1, %v2771_v60 }
 0x2af   : > { %v2761_v12 = vadd.f32 %v5282_v22, %v2739_v2  ;;  %v2740_v6 = vadd.f32 %v4223_v51, %v2716_v27  ;;  %v2148_v13 = vpop.f32.mrb[11].mxu1  ;;  %4390 = vmatprep.subr.bf16.mxu1 %v5195_v8 }
 0x2b0   : > { %v2759_v37 = vadd.f32 %v5282_v22, %v2737_v4  ;;  %v2738_v16 = vadd.f32 %v5264_v61, %v2148_v13  ;;  %4344 = vmatprep.mubr.bf16.mxu1 %v2785_v11 }
 0x2b1   : > { %v2762_v50 = vadd.f32 %v5282_v22, %v2740_v6  ;;  %4345 = vmatmul.mubr.bf16.gmra.mrb[20].mxu1 %v2786_v55  ;;  %v2777_v57 = vmax.f32 %v2761_v12, 0.0 }
 0x2b2   : > { %v2760_v10 = vadd.f32 %v5282_v22, %v2738_v16  ;;  %4398 = vmatpush3.bf16.msra.mxu1 %v5195_v8  ;;  %v2775_v26 = vmax.f32 %v2759_v37, 0.0 }
 0x2b3   : > { %v2778_v17 = vmax.f32 %v2762_v50, 0.0  ;;  %4391 = vmatprep.subr.bf16.mxu1 %v5205_v21 }
 0x2b4   : > { %v2776_v27 = vmax.f32 %v2760_v10, 0.0  ;;  %v4226_v38 = vpop.f32.mrb[12].mxu1 }
 0x2b5   : > { %v2743_v15 = vadd.f32 %v4226_v38, %v5268_v36  ;;  %v2161_v19 = vpop.f32.mrb[13].mxu1  ;;  %v2788_v25 = vpack.c.bf16 %v2778_v17, %v2777_v57 }
 0x2b6   : > { %v2741_v61 = vadd.f32 %v5274_v58, %v2161_v19  ;;  %4399 = vmatpush3.bf16.msra.mxu1 %v5205_v21  ;;  %v4227_v28 = vpop.f32.mrb[14].mxu1  ;;  %v2787_v3 = vpack.c.bf16 %v2776_v27, %v2775_v26 }
 0x2b7   : > { %v2765_v30 = vadd.f32 %v5282_v22, %v2743_v15  ;;  %v2744_v8 = vadd.f32 %v4227_v28, %v5271_v47  ;;  %v2164_v24 = vpop.f32.mrb[15].mxu1  ;;  %4392 = vmatprep.subr.bf16.mxu1 %v5215_v35 }
 0x2b8   : > { %v2763_v31 = vadd.f32 %v5282_v22, %v2741_v61  ;;  %v2742_v36 = vadd.f32 %v5277_v9, %v2164_v24  ;;  %4348 = vmatprep.mubr.bf16.mxu1 %v2787_v3 }
 0x2b9   : > { %v2766_v32 = vadd.f32 %v5282_v22, %v2744_v8  ;;  %4349 = vmatmul.mubr.bf16.gmra.mrb[24].mxu1 %v2788_v25  ;;  %v2781_v58 = vmax.f32 %v2765_v30, 0.0 }
 0x2ba   : > { %v2764_v21 = vadd.f32 %v5282_v22, %v2742_v36  ;;  %4400 = vmatpush3.bf16.msra.mxu1 %v5215_v35  ;;  %v2779_v47 = vmax.f32 %v2763_v31, 0.0  ;;  %v4692_v35 = vld [vmem:[%s4771_s15 + $0xf0] sm:$0xff]   ;;  %v4693_v22 = vld [vmem:[%s4771_s15 + $0xf8] sm:$0xff]  }
 0x2bb   : > { %v2782_v29 = vmax.f32 %v2766_v32, 0.0  ;;  %4393 = vmatprep.subr.bf16.mxu1 %v5226_v14 }
 0x2bc   : > { %v2780_v33 = vmax.f32 %v2764_v21, 0.0 }
 0x2bd   : > { %v2790_v34 = vpack.c.bf16 %v2782_v29, %v2781_v58 }
 0x2be   : > { %4401 = vmatpush3.bf16.msra.mxu1 %v5226_v14  ;;  %v2789_v9 = vpack.c.bf16 %v2780_v33, %v2779_v47  ;;  %v4694_v14 = vld [vmem:[%s4771_s15 + $0x100] sm:$0xff]   ;;  %s3664_s15 = sshll.u32 %s5376_s25, 6 }
 0x2bf   : > { %4394 = vmatprep.subr.bf16.mxu1 %v5236_v18  ;;  %s5340_s28 = scalar_lea.vmem %s5372_s7, %s3664_s15 }
 0x2c0   : > { %4352 = vmatprep.mubr.bf16.mxu1 %v2789_v9 }
 0x2c1   : > { %4353 = vmatmul.mubr.bf16.gmra.mrb[28].mxu1 %v2790_v34 }
 0x2c2   : > { %4402 = vmatpush3.bf16.msra.mxu1 %v5236_v18  ;;  %4376 = vmatprep.mubr.bf16.mxu1 %v4691_v39 }
 0x2c3   : > { %4395 = vmatprep.subr.bf16.mxu1 %v5246_v20 }
 0x2c5   : > { %v4374_v23 = vpop.f32.mrb[88].mxu0 }
 0x2c6   : > { %4403 = vmatpush3.bf16.msra.mxu1 %v5246_v20  ;;  %v3121_v41 = vpop.f32.mrb[89].mxu0 }
 0x2c7   : > { %v4375_v18 = vpop.f32.mrb[90].mxu0 }
 0x2c8   : > { %v3124_v48 = vpop.f32.mrb[91].mxu0 }
 0x2c9   : > { %4377 = vmatmul.mubr.bf16.vlgmr.msra.gmra.mrb[20].mxu1 %v4692_v35 }
 0x2ca   : > { %4380 = vmatprep.mubr.bf16.mxu1 %v4693_v22 }
 0x2d1   : > { %4381 = vmatmul.mubr.bf16.gmra.mrb[24].mxu1 %v4694_v14 }
 0x2d2   : > { %4384 = vmatprep.mubr.bf16.mxu1 %v4695_v40 }
 0x2d9   : > { %4385 = vmatmul.mubr.bf16.gmra.mrb[28].mxu1 %v4696_v46 }
 0x37c   : > { %v4342_v20 = vpop.f32.mrb[16].mxu1 }
 0x37d   : > { %v2904_v49 = vadd.f32 %v4342_v20, %v5330_v42  ;;  %v2895_v44 = vpop.f32.mrb[17].mxu1 }
 0x37e   : > { %v2896_v52 = vadd.f32 %v5330_v42, %v2895_v44  ;;  %v4343_v53 = vpop.f32.mrb[18].mxu1 }
 0x37f   : > { %v2907_v54 = vadd.f32 %v4343_v53, %v5330_v42  ;;  %v3186_v56 = vadd.f32 %v4374_v23, %v2904_v49  ;;  %v2898_v45 = vpop.f32.mrb[19].mxu1 }
 0x380   : > { %v2899_v63 = vadd.f32 %v5330_v42, %v2898_v45  ;;  %v3184_v7 = vadd.f32 %v3121_v41, %v2896_v52 }
 0x381   : > { %v3187_v0 = vadd.f32 %v4375_v18, %v2907_v54  ;;  %v3202_v43 = vmax.f32 %v3186_v56, 0.0 }
 0x382   : > { %v3185_v59 = vadd.f32 %v3124_v48, %v2899_v63  ;;  %v3200_v1 = vmax.f32 %v3184_v7, 0.0 }
 0x383   : > { %v3203_v60 = vmax.f32 %v3187_v0, 0.0 }
 0x384   : > { %v3201_v62 = vmax.f32 %v3185_v59, 0.0 }
 0x385   : > { %v3689_v2 = vpack.c.bf16 %v3203_v60, %v3202_v43 }
 0x386   : > { %v3684_v5 = vpack.c.bf16 %v3201_v62, %v3200_v1 }
 0x387   : > { %3721 = vst [vmem:[%s5340_s28 + $0x8] sm:$0xff] %v3689_v2  }
 0x388   : > { %3685 = vst [vmem:[%s5340_s28] sm:$0xff] %v3684_v5  }
 0x39c   : > { %v4378_v55 = vpop.f32.mrb[20].mxu1 }
 0x39d   : > { %v4412_v4 = vadd.f32 %v4378_v55, %v5330_v42  ;;  %v3137_v51 = vpop.f32.mrb[21].mxu1 }
 0x39e   : > { %v4413_v11 = vadd.f32 %v5330_v42, %v3137_v51  ;;  %v4379_v12 = vpop.f32.mrb[22].mxu1 }
 0x39f   : > { %v4414_v6 = vadd.f32 %v4379_v12, %v5330_v42  ;;  %v3140_v13 = vpop.f32.mrb[23].mxu1  ;;  %v3206_v16 = vmax.f32 %v4412_v4, 0.0 }
 0x3a0   : > { %v4415_v37 = vadd.f32 %v5330_v42, %v3140_v13  ;;  %v3204_v10 = vmax.f32 %v4413_v11, 0.0 }
 0x3a1   : > { %v3207_v50 = vmax.f32 %v4414_v6, 0.0 }
 0x3a2   : > { %v3205_v57 = vmax.f32 %v4415_v37, 0.0 }
 0x3a3   : > { %v3699_v17 = vpack.c.bf16 %v3207_v50, %v3206_v16 }
 0x3a4   : > { %v3694_v26 = vpack.c.bf16 %v3205_v57, %v3204_v10  ;;  %v4382_v27 = vpop.f32.mrb[24].mxu1 }
 0x3a5   : > { %3723 = vst [vmem:[%s5340_s28 + $0x18] sm:$0xff] %v3699_v17   ;;  %v4416_v38 = vadd.f32 %v4382_v27, %v5330_v42  ;;  %v3153_v15 = vpop.f32.mrb[25].mxu1 }
 0x3a6   : > { %3722 = vst [vmem:[%s5340_s28 + $0x10] sm:$0xff] %v3694_v26   ;;  %v4417_v19 = vadd.f32 %v5330_v42, %v3153_v15  ;;  %v4383_v25 = vpop.f32.mrb[26].mxu1 }
 0x3a7   : > { %v4418_v61 = vadd.f32 %v4383_v25, %v5330_v42  ;;  %v3156_v28 = vpop.f32.mrb[27].mxu1  ;;  %v3210_v30 = vmax.f32 %v4416_v38, 0.0 }
 0x3a8   : > { %v4419_v3 = vadd.f32 %v5330_v42, %v3156_v28  ;;  %v3208_v24 = vmax.f32 %v4417_v19, 0.0 }
 0x3a9   : > { %v3211_v8 = vmax.f32 %v4418_v61, 0.0 }
 0x3aa   : > { %v3209_v31 = vmax.f32 %v4419_v3, 0.0 }
 0x3ab   : > { %v3709_v36 = vpack.c.bf16 %v3211_v8, %v3210_v30 }
 0x3ac   : > { %v3704_v32 = vpack.c.bf16 %v3209_v31, %v3208_v24  ;;  %v4386_v21 = vpop.f32.mrb[28].mxu1 }
 0x3ad   : > { %3725 = vst [vmem:[%s5340_s28 + $0x28] sm:$0xff] %v3709_v36   ;;  %v4420_v58 = vadd.f32 %v4386_v21, %v5330_v42  ;;  %v3169_v29 = vpop.f32.mrb[29].mxu1 }
 0x3ae   : > { %3724 = vst [vmem:[%s5340_s28 + $0x20] sm:$0xff] %v3704_v32   ;;  %v4421_v47 = vadd.f32 %v5330_v42, %v3169_v29  ;;  %v4387_v33 = vpop.f32.mrb[30].mxu1 }
 0x3af   : > { %v4422_v34 = vadd.f32 %v4387_v33, %v5330_v42  ;;  %v3172_v9 = vpop.f32.mrb[31].mxu1  ;;  %v3214_v35 = vmax.f32 %v4420_v58, 0.0 }
 0x3b0   : > { %v4423_v39 = vadd.f32 %v5330_v42, %v3172_v9  ;;  %v3212_v14 = vmax.f32 %v4421_v47, 0.0 }
 0x3b1   : > { %v3215_v22 = vmax.f32 %v4422_v34, 0.0 }
 0x3b2   : > { %v3213_v40 = vmax.f32 %v4423_v39, 0.0 }
 0x3b3   : > { %v3719_v46 = vpack.c.bf16 %v3215_v22, %v3214_v35 }
 0x3b4   : > { %v3714_v23 = vpack.c.bf16 %v3213_v40, %v3212_v14 }
 0x3b5   : > { %3727 = vst [vmem:[%s5340_s28 + $0x38] sm:$0xff] %v3719_v46  }
 0x3b6   : > { %3726 = vst [vmem:[%s5340_s28 + $0x30] sm:$0xff] %v3714_v23  }
 0x3b7 PF: > { %s17_s24 = sadd.s32 1, %s4703_s24  }
 0x3b8   : > { %p14_p5 = scmp.ge.s32.totalorder %s17_s24, 4  }
 0x3ba   :  { %16 = sbr.rel (!%p14_p5) target bundleno = 1 (0x1), region = 92 }

</bundles_post_ra>
